<compile_context>
chip_gen: v5e
topology: v5e:2x2
jax: 0.10.0
libtpu: 0.0.40
codegen_flags: <defaults>
</compile_context>

<pallas_src>
import functools
import math

import jax
import jax.numpy as jnp
from jax import lax
from jax.experimental import pallas as pl
from jax.experimental.pallas import tpu as pltpu

BN_EPS = 1e-5
LANE = 128
SUBLANE = 8
MAX_TM1 = 2048      # cap on phase-1 rows per tile
MAX_TM2 = 4096      # cap on phase-2 rows per tile (mem-bound elementwise pass)


def _round_up(x, m):
    return (x + m - 1) // m * m


def _vmem_caps():
    """(vmem_limit_bytes, tile_budget_bytes, split_cout) per TPU generation."""
    phys = None
    try:
        phys = int(pltpu.get_tpu_info().vmem_capacity_bytes)
        if phys <= 0:
            phys = None
    except Exception:
        phys = None
    kind = ""
    try:
        kind = jax.devices()[0].device_kind.lower()
    except Exception:
        pass
    if phys is None:
        if "v7" in kind:
            phys = 64 * 2**20                  # v7x: 64 MiB per TensorCore
        elif any(t in kind for t in ("v3", "v4", "v5", "v6")):
            phys = 128 * 2**20                 # v5e/v6e (and v4/v5p): 128 MiB
        else:
            phys = 64 * 2**20                  # unknown chip: stay conservative
    limit = min(phys * 3 // 4, 100 * 2**20)    # scoped limit, leave headroom
    budget = min(phys // 2, 64 * 2**20)        # what the tile choice may use
    split_cout = "v7" in kind                  # 2 TC/chip -> parallel Cout axis
    return int(limit), int(budget), bool(split_cout)


def _phase1_geom(m_rows, k, cout, wp, budget, split_cout):
    """Tile geometry for one conv block."""
    kp = _round_up(k, LANE)
    # 256-align Cout for the 2x256x256 MXUs (v6e/v7x); 128 stays optimal on v5e
    # and for small layers.
    cp = _round_up(cout, 256) if cout >= 256 else _round_up(cout, LANE)
    tn = 256 if (split_cout and cp > 256) else cp
    # Tiles must cover whole padded image rows (roll wrap -> junk cols only)
    # and keep the (8,128) block-shape constraint on the sublane dim.
    row_align = math.lcm(SUBLANE, wp)

    # Phase-1 VMEM: xv (bf16, 2 bufs) + z (bf16, 2 bufs) + ~7 f32 (TM,TN)
    # temporaries (3 dots, 2 rolls, z, z*z) + the (3,Kp,TN) bf16 weight block.
    w_bytes = 2 * 3 * kp * tn * 2
    per_row1 = 4 * kp + 4 * tn + 28 * tn
    tm1 = (budget - w_bytes) // per_row1
    tm1 = (tm1 // row_align) * row_align
    tm1_cap = max(row_align, (MAX_TM1 // row_align) * row_align)
    tm1 = max(row_align, min(tm1, tm1_cap, _round_up(m_rows, row_align)))

    # Phase-2 tile: a multiple of tm1 so both grids divide Mp evenly.
    per_row2 = 4 * cp + 8 * cp + 4 * cp        # z bf16 x2 + out f32 x2 + slack
    tm2_rows = min(max(tm1, budget // per_row2), MAX_TM2,
                   _round_up(m_rows, tm1))
    tm2 = max(1, tm2_rows // tm1) * tm1
    mp = _round_up(m_rows, tm2)
    return kp, cp, tn, int(tm1), int(tm2), int(mp)


# ---------------------------------------------------------------------------
# Phase 1: semi-implicit 3x3 conv on the MXU + per-channel batch statistics.
# ---------------------------------------------------------------------------
def _conv_stats_kernel(x_ref, w_ref, z_ref, sum_ref, ssq_ref, *, wp):
    """x:(TM,Kp) bf16 (3 vertical taps stacked), w:(3,Kp,TN) bf16 (one slice
    per horizontal tap), z:(TM,TN) bf16, sum/ssq:(1,TN) f32 resident stats."""
    x = x_ref[...]
    tm = x.shape[0]
    # One MXU dot per horizontal tap dx; the +/-1 pixel shift is applied to the
    # f32 partial results with a sublane roll (32-bit rows -> no bf16 packing
    # issues).  Wrapped rows land on the padded junk columns only.
    y0 = jnp.dot(x, w_ref[0], preferred_element_type=jnp.float32)
    y1 = jnp.dot(x, w_ref[1], preferred_element_type=jnp.float32)
    y2 = jnp.dot(x, w_ref[2], preferred_element_type=jnp.float32)
    z = pltpu.roll(y0, 1, axis=0) + y1 + pltpu.roll(y2, tm - 1, axis=0)
    z_ref[...] = z.astype(z_ref.dtype)

    # Tile-local column index (TM is a multiple of wp, so local == global):
    # columns w' in {0, wp-1} are padding (junk outputs) and must not
    # contribute to the batch statistics.
    col = lax.broadcasted_iota(jnp.int32, (1, tm), 1) % wp
    mask = ((col != 0) & (col != wp - 1)).astype(jnp.float32)    # (1, TM)

    @pl.when(pl.program_id(1) == 0)          # first M tile of this Cout tile
    def _init():
        sum_ref[...] = jnp.zeros_like(sum_ref)
        ssq_ref[...] = jnp.zeros_like(ssq_ref)

    # Channel sums via the MXU (mask-row matmuls) instead of cross-sublane
    # VPU/XLU reductions; free filler once the main matmul dominates.
    sum_ref[...] += jnp.dot(mask, z, preferred_element_type=jnp.float32)
    ssq_ref[...] += jnp.dot(mask, z * z, preferred_element_type=jnp.float32)


# ---------------------------------------------------------------------------
# Phase 2: folded BatchNorm affine + ReLU (pure VPU, mem-bound, big tiles).
# Only used for the final block; intermediate blocks fuse this into the next
# block's XLA-side prep.
# ---------------------------------------------------------------------------
def _bn_relu_kernel(z_ref, scale_ref, shift_ref, out_ref):
    y = z_ref[...].astype(jnp.float32) * scale_ref[...] + shift_ref[...]
    out_ref[...] = jnp.maximum(y, 0.0).astype(out_ref.dtype)


def _build_xv(act_nhwc):
    """Vertical-tap semi-im2col: (N,H,W,C) -> (N*H*(W+2), 3*C) bf16."""
    N, H, W, _ = act_nhwc.shape
    a = act_nhwc.astype(jnp.bfloat16)
    ap = jnp.pad(a, ((0, 0), (1, 1), (1, 1), (0, 0)))
    xv = jnp.concatenate([ap[:, 0:H], ap[:, 1:H + 1], ap[:, 2:H + 2]], axis=-1)
    return xv.reshape(N * H * (W + 2), 3 * a.shape[-1])


def _to_nhwc_valid(flat, g):
    """(Mp, Cp) -> (N, H, W, Cout): drop row padding, junk cols, pad channels."""
    x = flat[:g["m_rows"]].reshape(g["N"], g["H"], g["Wp"], flat.shape[-1])
    return x[:, :, 1:g["W"] + 1, :g["Cout"]]


def _conv_phase1(act_nhwc, w, gamma, beta, caps):
    """Conv3x3(pad=1) of one block + batch stats -> (z, scale, shift, geom)."""
    limit, budget, split_cout = caps
    N, H, W, Cin = act_nhwc.shape
    kh, kw, wcin, Cout = w.shape
    assert (kh, kw, wcin) == (3, 3, Cin)
    Wp = W + 2
    K = 3 * Cin
    M = N * H * W                        # real pixels (for the batch mean)
    m_rows = N * H * Wp                  # flattened rows incl. junk columns
    Kp, Cp, TN, TM1, TM2, Mp = _phase1_geom(m_rows, K, Cout, Wp, budget,
                                            split_cout)
    num_j = Cp // TN
    num_i = Mp // TM1

    xv = _build_xv(act_nhwc)
    xv = jnp.pad(xv, ((0, Mp - m_rows), (0, Kp - K)))

    # Wv[dx][dy*Cin + cin, cout] = w[dy, dx, cin, cout]  (matches xv's dy-major
    # channel stacking).
    wv = jnp.transpose(w, (1, 0, 2, 3)).reshape(3, K, Cout).astype(jnp.bfloat16)
    wv = jnp.pad(wv, ((0, 0), (0, Kp - K), (0, Cp - Cout)))

    z, csum, cssq = pl.pallas_call(
        functools.partial(_conv_stats_kernel, wp=Wp),
        out_shape=(jax.ShapeDtypeStruct((Mp, Cp), jnp.bfloat16),
                   jax.ShapeDtypeStruct((1, Cp), jnp.float32),
                   jax.ShapeDtypeStruct((1, Cp), jnp.float32)),
        grid=(num_j, num_i),
        in_specs=[pl.BlockSpec((TM1, Kp), lambda j, i: (i, 0)),
                  pl.BlockSpec((3, Kp, TN), lambda j, i: (0, 0, j))],
        out_specs=(pl.BlockSpec((TM1, TN), lambda j, i: (i, j)),
                   pl.BlockSpec((1, TN), lambda j, i: (0, j)),
                   pl.BlockSpec((1, TN), lambda j, i: (0, j))),
        compiler_params=pltpu.CompilerParams(
            dimension_semantics=("parallel", "arbitrary"),
            vmem_limit_bytes=limit),
    )(xv, wv)

    # Fold training-mode BN (biased variance, like nn.BatchNorm2d forward) into
    # one per-channel scale/shift pair (tiny (1,Cp) host-side math).
    # NOTE: E[x^2]-E[x]^2 in f32 can lose precision for very large batches; a
    # Welford-style merge would be the next step if tolerances tighten.
    inv_m = 1.0 / float(M)
    mean = csum * inv_m
    var = jnp.maximum(cssq * inv_m - mean * mean, 0.0)
    gamma_p = jnp.pad(gamma.astype(jnp.float32), (0, Cp - Cout)).reshape(1, Cp)
    beta_p = jnp.pad(beta.astype(jnp.float32), (0, Cp - Cout)).reshape(1, Cp)
    scale = gamma_p * lax.rsqrt(var + BN_EPS)
    shift = beta_p - mean * scale

    geom = dict(N=N, H=H, W=W, Wp=Wp, Cout=Cout, Cp=Cp, m_rows=m_rows,
                Mp=Mp, TM2=TM2)
    return z, scale, shift, geom


def _bn_relu_phase2(z, scale, shift, g, limit):
    Mp, Cp = z.shape
    TM2 = g["TM2"]
    return pl.pallas_call(
        _bn_relu_kernel,
        out_shape=jax.ShapeDtypeStruct((Mp, Cp), jnp.float32),
        grid=(Mp // TM2,),
        in_specs=[pl.BlockSpec((TM2, Cp), lambda i: (i, 0)),
                  pl.BlockSpec((1, Cp), lambda i: (0, 0)),
                  pl.BlockSpec((1, Cp), lambda i: (0, 0))],
        out_specs=pl.BlockSpec((TM2, Cp), lambda i: (i, 0)),
        compiler_params=pltpu.CompilerParams(
            dimension_semantics=("parallel",),      # independent tiles
            vmem_limit_bytes=limit),
    )(z, scale, shift)


def init_params(key, in_channel, out_channel, num_layers):
    """Deterministic parameter init mirroring the module's __init__ shapes."""
    params = []
    cin = in_channel
    for _ in range(num_layers):
        key, kw_, kb_ = jax.random.split(key, 3)
        fan_in = 9 * cin
        w = jax.random.normal(kw_, (3, 3, cin, out_channel),
                              jnp.float32) * (1.0 / math.sqrt(fan_in))
        b = jax.random.normal(kb_, (out_channel,), jnp.float32) * 0.01
        gamma = jnp.ones((out_channel,), jnp.float32)   # BatchNorm2d default
        beta = jnp.zeros((out_channel,), jnp.float32)   # BatchNorm2d default
        params.append((w, b, gamma, beta))
        cin = out_channel
    return params


def cnn_layer_forward(x_nchw, params):
    """Forward of CNN_layer. Input/output are NCHW like the PyTorch module."""
    caps = _vmem_caps()
    act = jnp.transpose(x_nchw, (0, 2, 3, 1)).astype(jnp.float32)  # NCHW->NHWC
    n_blocks = len(params)
    out = None
    for idx, (w, b, gamma, beta) in enumerate(params):
        del b   # cancelled exactly by the training-mode BN mean subtraction
        z, scale, shift, g = _conv_phase1(act, w, gamma, beta, caps)
        if idx + 1 < n_blocks:
            # Intermediate blocks: BN affine + ReLU is applied by XLA and fuses
            # into the next block's pad/shift/concat prep -> saves the full
            # (Mp,Cp) activation HBM round trip of a standalone phase-2 pass.
            zr = _to_nhwc_valid(z, g).astype(jnp.float32)
            y = zr * scale[0, :g["Cout"]] + shift[0, :g["Cout"]]
            act = jnp.maximum(y, 0.0).astype(jnp.bfloat16)
        else:
            yf = _bn_relu_phase2(z, scale, shift, g, caps[0])
            out = _to_nhwc_valid(yf, g)
    return jnp.transpose(out, (0, 3, 1, 2))             # NHWC -> NCHW


def reference_forward(x_nchw, params):
    """Pure-JAX f32 reference (conv + training-mode BN + ReLU), incl. bias."""
    x = jnp.transpose(x_nchw, (0, 2, 3, 1))
    for (w, b, gamma, beta) in params:
        z = lax.conv_general_dilated(
            x, w, window_strides=(1, 1), padding="SAME",
            dimension_numbers=("NHWC", "HWIO", "NHWC")) + b
        mean = jnp.mean(z, axis=(0, 1, 2), keepdims=True)
        var = jnp.mean((z - mean) ** 2, axis=(0, 1, 2), keepdims=True)
        y = (z - mean) * lax.rsqrt(var + BN_EPS) * gamma + beta
        x = jnp.maximum(y, 0.0)
    return jnp.transpose(x, (0, 3, 1, 2))


if __name__ == "__main__":
    # Small, module-consistent shapes.
    N, Cin, H, W = 2, 4, 16, 16
    Cout, num_layers = 8, 2

    key = jax.random.PRNGKey(0)
    key, kx = jax.random.split(key)
    x = jax.random.normal(kx, (N, Cin, H, W), jnp.float32)   # NCHW input

    params = init_params(key, Cin, Cout, num_layers)

    fwd = jax.jit(cnn_layer_forward)
    y = jax.block_until_ready(fwd(x, params))

    assert y.shape == (N, Cout, H, W)
    assert y.dtype == jnp.float32
    assert bool(jnp.all(y >= 0.0))                 # ReLU output
    assert bool(jnp.all(jnp.isfinite(y)))

    # Numerical check vs the f32 reference (bf16 matmul/operand rounding only).
    y_ref = jax.block_until_ready(reference_forward(x, params))
    err = float(jnp.max(jnp.abs(y - y_ref)))
    assert err < 0.2, f"max abs err vs f32 reference too large: {err}"

    print("KERNEL_OK")
</pallas_src>

<mosaic_0001>
module attributes {stable_mosaic.version = 11 : i64} {
  func.func @_conv_stats_kernel(%arg0: i32, %arg1: i32, %arg2: memref<576x128xbf16, #tpu.memory_space<vmem>>, %arg3: memref<3x128x128xbf16, #tpu.memory_space<vmem>>, %arg4: memref<576x128xbf16, #tpu.memory_space<vmem>>, %arg5: memref<1x128xf32, #tpu.memory_space<vmem>>, %arg6: memref<1x128xf32, #tpu.memory_space<vmem>>) attributes {dimension_semantics = [#tpu.dimension_semantics<parallel>, #tpu.dimension_semantics<arbitrary>], iteration_bounds = array<i64: 1, 1>, scalar_prefetch = 0 : i64, scratch_operands = 0 : i64, tpu.core_type = #tpu.core_type<tc>, window_params = [{transform_indices = @transform_0, window_bounds = array<i64: 576, 128>}, {transform_indices = @transform_1, window_bounds = array<i64: 3, 128, 128>}, {transform_indices = @transform_2, window_bounds = array<i64: 576, 128>}, {transform_indices = @transform_3, window_bounds = array<i64: 1, 128>}, {transform_indices = @transform_4, window_bounds = array<i64: 1, 128>}]} {
    %c0 = arith.constant 0 : index
    %c0_0 = arith.constant 0 : index
    %0 = vector.load %arg2[%c0, %c0_0] : memref<576x128xbf16, #tpu.memory_space<vmem>>, vector<576x128xbf16>
    %c0_1 = arith.constant 0 : index
    %c0_2 = arith.constant 0 : index
    %c0_3 = arith.constant 0 : index
    %1 = vector.load %arg3[%c0_1, %c0_2, %c0_3] : memref<3x128x128xbf16, #tpu.memory_space<vmem>>, vector<1x128x128xbf16>
    %2 = vector.shape_cast %1 : vector<1x128x128xbf16> to vector<128x128xbf16>
    %cst = arith.constant dense<0.000000e+00> : vector<576x128xf32>
    %3 = tpu.matmul %0, %2, %cst {dimension_numbers = #tpu.dot_dimension_numbers<[1], [0], [0], [1], [0, 0, 1, 1], [], []>} : vector<576x128xbf16>, vector<128x128xbf16>, vector<576x128xf32> -> vector<576x128xf32>
    %c1 = arith.constant 1 : index
    %c0_4 = arith.constant 0 : index
    %c0_5 = arith.constant 0 : index
    %4 = vector.load %arg3[%c1, %c0_4, %c0_5] : memref<3x128x128xbf16, #tpu.memory_space<vmem>>, vector<1x128x128xbf16>
    %5 = vector.shape_cast %4 : vector<1x128x128xbf16> to vector<128x128xbf16>
    %cst_6 = arith.constant dense<0.000000e+00> : vector<576x128xf32>
    %6 = tpu.matmul %0, %5, %cst_6 {dimension_numbers = #tpu.dot_dimension_numbers<[1], [0], [0], [1], [0, 0, 1, 1], [], []>} : vector<576x128xbf16>, vector<128x128xbf16>, vector<576x128xf32> -> vector<576x128xf32>
    %c2 = arith.constant 2 : index
    %c0_7 = arith.constant 0 : index
    %c0_8 = arith.constant 0 : index
    %7 = vector.load %arg3[%c2, %c0_7, %c0_8] : memref<3x128x128xbf16, #tpu.memory_space<vmem>>, vector<1x128x128xbf16>
    %8 = vector.shape_cast %7 : vector<1x128x128xbf16> to vector<128x128xbf16>
    %cst_9 = arith.constant dense<0.000000e+00> : vector<576x128xf32>
    %9 = tpu.matmul %0, %8, %cst_9 {dimension_numbers = #tpu.dot_dimension_numbers<[1], [0], [0], [1], [0, 0, 1, 1], [], []>} : vector<576x128xbf16>, vector<128x128xbf16>, vector<576x128xf32> -> vector<576x128xf32>
    %c1_i32 = arith.constant 1 : i32
    %10 = tpu.dynamic_rotate %3 by %c1_i32 dim 0 : vector<576x128xf32>, i32 -> vector<576x128xf32>
    %11 = arith.addf %10, %6 : vector<576x128xf32>
    %c575_i32 = arith.constant 575 : i32
    %12 = tpu.dynamic_rotate %9 by %c575_i32 dim 0 : vector<576x128xf32>, i32 -> vector<576x128xf32>
    %13 = arith.addf %11, %12 : vector<576x128xf32>
    %14 = arith.truncf %13 : vector<576x128xf32> to vector<576x128xbf16>
    %c0_10 = arith.constant 0 : index
    %c0_11 = arith.constant 0 : index
    %15 = vector.load %arg4[%c0_10, %c0_11] : memref<576x128xbf16, #tpu.memory_space<vmem>>, vector<576x128xbf16>
    tpu.vector_store %arg4[%c0_10, %c0_11], %14 {strides = array<i32>} : memref<576x128xbf16, #tpu.memory_space<vmem>>, vector<576x128xbf16>,
    %16 = tpu.iota {dimensions = array<i32: 1>} : vector<1x576xi32>
    %c18_i32 = arith.constant 18 : i32
    %c0_i32 = arith.constant 0 : i32
    %17 = arith.cmpi eq, %c18_i32, %c0_i32 : i32
    %c1_i32_12 = arith.constant 1 : i32
    %18 = arith.select %17, %c1_i32_12, %c18_i32 : i32
    %19 = vector.broadcast %18 : i32 to vector<1x576xi32>
    %20 = arith.remsi %16, %19 : vector<1x576xi32>
    %c0_i32_13 = arith.constant 0 : i32
    %21 = vector.broadcast %c0_i32_13 : i32 to vector<1x576xi32>
    %22 = arith.cmpi ne, %20, %21 : vector<1x576xi32>
    %c0_i32_14 = arith.constant 0 : i32
    %23 = vector.broadcast %c0_i32_14 : i32 to vector<1x576xi32>
    %24 = arith.cmpi slt, %20, %23 : vector<1x576xi32>
    %c0_i32_15 = arith.constant 0 : i32
    %25 = arith.cmpi slt, %18, %c0_i32_15 : i32
    %26 = vector.broadcast %25 : i1 to vector<1x576xi1>
    %27 = vector.broadcast %26 : vector<1x576xi1> to vector<1x576xi1>
    %28 = arith.xori %24, %27 : vector<1x576xi1>
    %29 = arith.andi %28, %22 : vector<1x576xi1>
    %30 = vector.broadcast %18 : i32 to vector<1x576xi32>
    %31 = arith.addi %20, %30 : vector<1x576xi32>
    %32 = arith.select %29, %31, %20 : vector<1x576xi1>, vector<1x576xi32>
    %c0_i32_16 = arith.constant 0 : i32
    %33 = vector.broadcast %c0_i32_16 : i32 to vector<1x576xi32>
    %34 = arith.cmpi ne, %32, %33 : vector<1x576xi32>
    %c17_i32 = arith.constant 17 : i32
    %35 = vector.broadcast %c17_i32 : i32 to vector<1x576xi32>
    %36 = arith.cmpi ne, %32, %35 : vector<1x576xi32>
    %37 = arith.andi %34, %36 : vector<1x576xi1>
    %38 = arith.extui %37 : vector<1x576xi1> to vector<1x576xi32>
    %39 = arith.sitofp %38 : vector<1x576xi32> to vector<1x576xf32>
    %c0_i32_17 = arith.constant 0 : i32
    %40 = arith.cmpi eq, %arg1, %c0_i32_17 : i32
    %41 = arith.extui %40 : i1 to i32
    %c0_i32_18 = arith.constant 0 : i32
    %42 = arith.cmpi ne, %41, %c0_i32_18 : i32
    scf.if %42 {
      %cst_29 = arith.constant 0.000000e+00 : f32
      %52 = vector.broadcast %cst_29 : f32 to vector<1x128xf32>
      %c0_30 = arith.constant 0 : index
      %c0_31 = arith.constant 0 : index
      %53 = vector.load %arg5[%c0_30, %c0_31] : memref<1x128xf32, #tpu.memory_space<vmem>>, vector<1x128xf32>
      tpu.vector_store %arg5[%c0_30, %c0_31], %52 {strides = array<i32>} : memref<1x128xf32, #tpu.memory_space<vmem>>, vector<1x128xf32>,
      %cst_32 = arith.constant 0.000000e+00 : f32
      %54 = vector.broadcast %cst_32 : f32 to vector<1x128xf32>
      %c0_33 = arith.constant 0 : index
      %c0_34 = arith.constant 0 : index
      %55 = vector.load %arg6[%c0_33, %c0_34] : memref<1x128xf32, #tpu.memory_space<vmem>>, vector<1x128xf32>
      tpu.vector_store %arg6[%c0_33, %c0_34], %54 {strides = array<i32>} : memref<1x128xf32, #tpu.memory_space<vmem>>, vector<1x128xf32>,
    } else {
    }
    %c0_19 = arith.constant 0 : index
    %c0_20 = arith.constant 0 : index
    %43 = vector.load %arg5[%c0_19, %c0_20] : memref<1x128xf32, #tpu.memory_space<vmem>>, vector<1x128xf32>
    %cst_21 = arith.constant dense<0.000000e+00> : vector<1x128xf32>
    %44 = tpu.matmul %39, %13, %cst_21 {dimension_numbers = #tpu.dot_dimension_numbers<[1], [0], [0], [1], [0, 0, 1, 1], [], []>} : vector<1x576xf32>, vector<576x128xf32>, vector<1x128xf32> -> vector<1x128xf32>
    %45 = arith.addf %43, %44 : vector<1x128xf32>
    %c0_22 = arith.constant 0 : index
    %c0_23 = arith.constant 0 : index
    %46 = vector.load %arg5[%c0_22, %c0_23] : memref<1x128xf32, #tpu.memory_space<vmem>>, vector<1x128xf32>
    tpu.vector_store %arg5[%c0_22, %c0_23], %45 {strides = array<i32>} : memref<1x128xf32, #tpu.memory_space<vmem>>, vector<1x128xf32>,
    %c0_24 = arith.constant 0 : index
    %c0_25 = arith.constant 0 : index
    %47 = vector.load %arg6[%c0_24, %c0_25] : memref<1x128xf32, #tpu.memory_space<vmem>>, vector<1x128xf32>
    %48 = arith.mulf %13, %13 : vector<576x128xf32>
    %cst_26 = arith.constant dense<0.000000e+00> : vector<1x128xf32>
    %49 = tpu.matmul %39, %48, %cst_26 {dimension_numbers = #tpu.dot_dimension_numbers<[1], [0], [0], [1], [0, 0, 1, 1], [], []>} : vector<1x576xf32>, vector<576x128xf32>, vector<1x128xf32> -> vector<1x128xf32>
    %50 = arith.addf %47, %49 : vector<1x128xf32>
    %c0_27 = arith.constant 0 : index
    %c0_28 = arith.constant 0 : index
    %51 = vector.load %arg6[%c0_27, %c0_28] : memref<1x128xf32, #tpu.memory_space<vmem>>, vector<1x128xf32>
    tpu.vector_store %arg6[%c0_27, %c0_28], %50 {strides = array<i32>} : memref<1x128xf32, #tpu.memory_space<vmem>>, vector<1x128xf32>,
    return
  }
  func.func @transform_0(%arg0: i32, %arg1: i32) -> (i32, i32) {
    %c0_i32 = arith.constant 0 : i32
    %c0_i32_0 = arith.constant 0 : i32
    return %arg1, %c0_i32 : i32, i32
  }
  func.func @transform_1(%arg0: i32, %arg1: i32) -> (i32, i32, i32) {
    %c0_i32 = arith.constant 0 : i32
    %c0_i32_0 = arith.constant 0 : i32
    %c0_i32_1 = arith.constant 0 : i32
    return %c0_i32, %c0_i32_0, %arg0 : i32, i32, i32
  }
  func.func @transform_2(%arg0: i32, %arg1: i32) -> (i32, i32) {
    %c0_i32 = arith.constant 0 : i32
    return %arg1, %arg0 : i32, i32
  }
  func.func @transform_3(%arg0: i32, %arg1: i32) -> (i32, i32) {
    %c0_i32 = arith.constant 0 : i32
    %c0_i32_0 = arith.constant 0 : i32
    return %c0_i32, %arg0 : i32, i32
  }
  func.func @transform_4(%arg0: i32, %arg1: i32) -> (i32, i32) {
    %c0_i32 = arith.constant 0 : i32
    %c0_i32_0 = arith.constant 0 : i32
    return %c0_i32, %arg0 : i32, i32
  }
}

module attributes {stable_mosaic.version = 11 : i64} {
  func.func @_bn_relu_kernel(%arg0: i32, %arg1: memref<576x128xbf16, #tpu.memory_space<vmem>>, %arg2: memref<1x128xf32, #tpu.memory_space<vmem>>, %arg3: memref<1x128xf32, #tpu.memory_space<vmem>>, %arg4: memref<576x128xf32, #tpu.memory_space<vmem>>) attributes {dimension_semantics = [#tpu.dimension_semantics<parallel>], iteration_bounds = array<i64: 1>, scalar_prefetch = 0 : i64, scratch_operands = 0 : i64, tpu.core_type = #tpu.core_type<tc>, window_params = [{transform_indices = @transform_0, window_bounds = array<i64: 576, 128>}, {pipeline_mode = #tpu.pipeline_mode<synchronous>, transform_indices = @transform_1, window_bounds = array<i64: 1, 128>}, {pipeline_mode = #tpu.pipeline_mode<synchronous>, transform_indices = @transform_2, window_bounds = array<i64: 1, 128>}, {transform_indices = @transform_3, window_bounds = array<i64: 576, 128>}]} {
    %c0 = arith.constant 0 : index
    %c0_0 = arith.constant 0 : index
    %0 = vector.load %arg1[%c0, %c0_0] : memref<576x128xbf16, #tpu.memory_space<vmem>>, vector<576x128xbf16>
    %1 = arith.extf %0 : vector<576x128xbf16> to vector<576x128xf32>
    %c0_1 = arith.constant 0 : index
    %c0_2 = arith.constant 0 : index
    %2 = vector.load %arg2[%c0_1, %c0_2] : memref<1x128xf32, #tpu.memory_space<vmem>>, vector<1x128xf32>
    %3 = vector.broadcast %2 : vector<1x128xf32> to vector<576x128xf32>
    %4 = arith.mulf %1, %3 : vector<576x128xf32>
    %c0_3 = arith.constant 0 : index
    %c0_4 = arith.constant 0 : index
    %5 = vector.load %arg3[%c0_3, %c0_4] : memref<1x128xf32, #tpu.memory_space<vmem>>, vector<1x128xf32>
    %6 = vector.broadcast %5 : vector<1x128xf32> to vector<576x128xf32>
    %7 = arith.addf %4, %6 : vector<576x128xf32>
    %cst = arith.constant 0.000000e+00 : f32
    %8 = vector.broadcast %cst : f32 to vector<576x128xf32>
    %9 = arith.maximumf %7, %8 : vector<576x128xf32>
    %c0_5 = arith.constant 0 : index
    %c0_6 = arith.constant 0 : index
    %10 = vector.load %arg4[%c0_5, %c0_6] : memref<576x128xf32, #tpu.memory_space<vmem>>, vector<576x128xf32>
    tpu.vector_store %arg4[%c0_5, %c0_6], %9 {strides = array<i32>} : memref<576x128xf32, #tpu.memory_space<vmem>>, vector<576x128xf32>,
    return
  }
  func.func @transform_0(%arg0: i32) -> (i32, i32) {
    %c0_i32 = arith.constant 0 : i32
    %c0_i32_0 = arith.constant 0 : i32
    return %arg0, %c0_i32 : i32, i32
  }
  func.func @transform_1(%arg0: i32) -> (i32, i32) {
    %c0_i32 = arith.constant 0 : i32
    %c0_i32_0 = arith.constant 0 : i32
    %c0_i32_1 = arith.constant 0 : i32
    return %c0_i32, %c0_i32_0 : i32, i32
  }
  func.func @transform_2(%arg0: i32) -> (i32, i32) {
    %c0_i32 = arith.constant 0 : i32
    %c0_i32_0 = arith.constant 0 : i32
    %c0_i32_1 = arith.constant 0 : i32
    return %c0_i32, %c0_i32_0 : i32, i32
  }
  func.func @transform_3(%arg0: i32) -> (i32, i32) {
    %c0_i32 = arith.constant 0 : i32
    %c0_i32_0 = arith.constant 0 : i32
    return %arg0, %c0_i32 : i32, i32
  }
}

</mosaic_0001>

<bundles_post_ra>
// kernel: cnn_layer_forward.5
= control target key start
LH: loop header
LB: loop body
LE: loop exit
PB: predicated region body
PF: predicated region fallthrough
CT: control target
= control target key end

     0   :  { %s1137_s0 = inlined_call_operand.vmem [shape: bf16[576,128], index: 0, kind: input, shape index: {}]   ;;  %s1138_s1 = inlined_call_operand.vmem [shape: f32[1,128], index: 1, kind: input, shape index: {}]   ;;  %s1139_s2 = inlined_call_operand.vmem [shape: f32[1,128], index: 2, kind: input, shape index: {}]   ;;  %s1140_s3 = inlined_call_operand.vmem [shape: f32[576,128], index: 3, kind: output, shape index: {}]  }
   0x1   :  { %v459_v0 = vld [vmem:[%s1137_s0] sm:$0xff]   ;;  %v602_v5 = vld [vmem:[%s1137_s0 + $0x8] sm:$0xff]   ;;  %v603_v8 = vld [vmem:[%s1137_s0 + $0x10] sm:$0xff]  }
   0x2   :  { %v665_v1 = vld [vmem:[%s1138_s1] ss:$0 sm:$0xff]  ;;  %v460_v2 = vunpack.c.l.bf16 %v459_v0  ;;  %v461_v4 = vunpack.c.h.bf16 %v459_v0  ;;  %v464_v6 = vunpack.c.l.bf16 %v602_v5  ;;  %v465_v7 = vunpack.c.h.bf16 %v602_v5  ;;  %v604_v9 = vld [vmem:[%s1137_s0 + $0x18] sm:$0xff]   ;;  %v606_v31 = vld [vmem:[%s1137_s0 + $0x28] sm:$0xff]  }
   0x3   :  { %v670_v3 = vld [vmem:[%s1139_s2] ss:$0 sm:$0xff]  ;;  %v468_v12 = vunpack.c.l.bf16 %v603_v8  ;;  %v469_v13 = vunpack.c.h.bf16 %v603_v8  ;;  %v472_v16 = vunpack.c.l.bf16 %v604_v9  ;;  %v473_v17 = vunpack.c.h.bf16 %v604_v9  ;;  %v607_v36 = vld [vmem:[%s1137_s0 + $0x30] sm:$0xff]   ;;  %v608_v41 = vld [vmem:[%s1137_s0 + $0x38] sm:$0xff]  }
   0x4   :  { %v162_v10 = vmul.f32 %v665_v1, %v460_v2  ;;  %v163_v11 = vmul.f32 %v665_v1, %v461_v4  ;;  %v164_v14 = vmul.f32 %v665_v1, %v464_v6  ;;  %v165_v15 = vmul.f32 %v665_v1, %v465_v7  ;;  %v605_v26 = vld [vmem:[%s1137_s0 + $0x20] sm:$0xff]   ;;  %v610_v5 = vld [vmem:[%s1137_s0 + $0x48] sm:$0xff]  }
   0x5   :  { %v166_v20 = vmul.f32 %v665_v1, %v468_v12  ;;  %v167_v21 = vmul.f32 %v665_v1, %v469_v13  ;;  %v168_v24 = vmul.f32 %v665_v1, %v472_v16  ;;  %v169_v25 = vmul.f32 %v665_v1, %v473_v17  ;;  %v609_v62 = vld [vmem:[%s1137_s0 + $0x40] sm:$0xff]  }
   0x6   :  { %v238_v18 = vadd.f32 %v670_v3, %v162_v10  ;;  %v239_v19 = vadd.f32 %v670_v3, %v163_v11  ;;  %v240_v22 = vadd.f32 %v670_v3, %v164_v14  ;;  %v241_v23 = vadd.f32 %v670_v3, %v165_v15  ;;  %v611_v10 = vld [vmem:[%s1137_s0 + $0x50] sm:$0xff]   ;;  %v612_v15 = vld [vmem:[%s1137_s0 + $0x58] sm:$0xff]  }
   0x7   :  { %v242_v29 = vadd.f32 %v670_v3, %v166_v20  ;;  %v243_v30 = vadd.f32 %v670_v3, %v167_v21  ;;  %v244_v34 = vadd.f32 %v670_v3, %v168_v24  ;;  %v245_v35 = vadd.f32 %v670_v3, %v169_v25 }
   0x8   :  { %v310_v27 = vmax.f32 %v238_v18, 0.0  ;;  %v311_v28 = vmax.f32 %v239_v19, 0.0  ;;  %v312_v32 = vmax.f32 %v240_v22, 0.0  ;;  %v313_v33 = vmax.f32 %v241_v23, 0.0 }
   0x9   :  { %v314_v37 = vmax.f32 %v242_v29, 0.0  ;;  %v315_v38 = vmax.f32 %v243_v30, 0.0  ;;  %v476_v39 = vunpack.c.l.bf16 %v605_v26  ;;  %v477_v40 = vunpack.c.h.bf16 %v605_v26 }
   0xa   :  { %382 = vst [vmem:[%s1140_s3] sm:$0xff] %v310_v27  ;;  %v316_v42 = vmax.f32 %v244_v34, 0.0  ;;  %v317_v43 = vmax.f32 %v245_v35, 0.0  ;;  %v480_v44 = vunpack.c.l.bf16 %v606_v31  ;;  %v481_v45 = vunpack.c.h.bf16 %v606_v31 }
   0xb   :  { %383 = vst [vmem:[%s1140_s3 + $0x8] sm:$0xff] %v311_v28  ;;  %v170_v46 = vmul.f32 %v665_v1, %v476_v39  ;;  %v171_v47 = vmul.f32 %v665_v1, %v477_v40  ;;  %v484_v48 = vunpack.c.l.bf16 %v607_v36  ;;  %v485_v49 = vunpack.c.h.bf16 %v607_v36  ;;  %v613_v36 = vld [vmem:[%s1137_s0 + $0x60] sm:$0xff]  }
   0xc   :  { %384 = vst [vmem:[%s1140_s3 + $0x10] sm:$0xff] %v312_v32  ;;  %v172_v50 = vmul.f32 %v665_v1, %v480_v44  ;;  %v173_v51 = vmul.f32 %v665_v1, %v481_v45  ;;  %v488_v52 = vunpack.c.l.bf16 %v608_v41  ;;  %v489_v53 = vunpack.c.h.bf16 %v608_v41  ;;  %v614_v41 = vld [vmem:[%s1137_s0 + $0x68] sm:$0xff]  }
   0xd   :  { %385 = vst [vmem:[%s1140_s3 + $0x18] sm:$0xff] %v313_v33  ;;  %v246_v54 = vadd.f32 %v670_v3, %v170_v46  ;;  %v247_v55 = vadd.f32 %v670_v3, %v171_v47  ;;  %v174_v56 = vmul.f32 %v665_v1, %v484_v48  ;;  %v175_v57 = vmul.f32 %v665_v1, %v485_v49  ;;  %v615_v46 = vld [vmem:[%s1137_s0 + $0x70] sm:$0xff]  }
   0xe   :  { %386 = vst [vmem:[%s1140_s3 + $0x20] sm:$0xff] %v314_v37  ;;  %v248_v58 = vadd.f32 %v670_v3, %v172_v50  ;;  %v249_v59 = vadd.f32 %v670_v3, %v173_v51  ;;  %v176_v60 = vmul.f32 %v665_v1, %v488_v52  ;;  %v177_v61 = vmul.f32 %v665_v1, %v489_v53  ;;  %v616_v51 = vld [vmem:[%s1137_s0 + $0x78] sm:$0xff]  }
   0xf   :  { %387 = vst [vmem:[%s1140_s3 + $0x28] sm:$0xff] %v315_v38  ;;  %v318_v63 = vmax.f32 %v246_v54, 0.0  ;;  %v319_v0 = vmax.f32 %v247_v55, 0.0  ;;  %v250_v2 = vadd.f32 %v670_v3, %v174_v56  ;;  %v251_v4 = vadd.f32 %v670_v3, %v175_v57 }
  0x10   :  { %388 = vst [vmem:[%s1140_s3 + $0x30] sm:$0xff] %v316_v42  ;;  %v320_v6 = vmax.f32 %v248_v58, 0.0  ;;  %v321_v7 = vmax.f32 %v249_v59, 0.0  ;;  %v252_v8 = vadd.f32 %v670_v3, %v176_v60  ;;  %v253_v9 = vadd.f32 %v670_v3, %v177_v61 }
  0x11   :  { %389 = vst [vmem:[%s1140_s3 + $0x38] sm:$0xff] %v317_v43  ;;  %v322_v11 = vmax.f32 %v250_v2, 0.0  ;;  %v323_v12 = vmax.f32 %v251_v4, 0.0  ;;  %v492_v13 = vunpack.c.l.bf16 %v609_v62  ;;  %v493_v14 = vunpack.c.h.bf16 %v609_v62 }
  0x12   :  { %390 = vst [vmem:[%s1140_s3 + $0x40] sm:$0xff] %v318_v63  ;;  %v324_v16 = vmax.f32 %v252_v8, 0.0  ;;  %v325_v17 = vmax.f32 %v253_v9, 0.0  ;;  %v496_v18 = vunpack.c.l.bf16 %v610_v5  ;;  %v497_v19 = vunpack.c.h.bf16 %v610_v5 }
  0x13   :  { %391 = vst [vmem:[%s1140_s3 + $0x48] sm:$0xff] %v319_v0  ;;  %v178_v20 = vmul.f32 %v665_v1, %v492_v13  ;;  %v179_v21 = vmul.f32 %v665_v1, %v493_v14  ;;  %v500_v22 = vunpack.c.l.bf16 %v611_v10  ;;  %v501_v23 = vunpack.c.h.bf16 %v611_v10  ;;  %v617_v10 = vld [vmem:[%s1137_s0 + $0x80] sm:$0xff]  }
  0x14   :  { %392 = vst [vmem:[%s1140_s3 + $0x50] sm:$0xff] %v320_v6  ;;  %v180_v24 = vmul.f32 %v665_v1, %v496_v18  ;;  %v181_v25 = vmul.f32 %v665_v1, %v497_v19  ;;  %v504_v26 = vunpack.c.l.bf16 %v612_v15  ;;  %v505_v27 = vunpack.c.h.bf16 %v612_v15  ;;  %v618_v15 = vld [vmem:[%s1137_s0 + $0x88] sm:$0xff]  }
  0x15   :  { %393 = vst [vmem:[%s1140_s3 + $0x58] sm:$0xff] %v321_v7  ;;  %v254_v28 = vadd.f32 %v670_v3, %v178_v20  ;;  %v255_v29 = vadd.f32 %v670_v3, %v179_v21  ;;  %v182_v30 = vmul.f32 %v665_v1, %v500_v22  ;;  %v183_v31 = vmul.f32 %v665_v1, %v501_v23  ;;  %v619_v20 = vld [vmem:[%s1137_s0 + $0x90] sm:$0xff]  }
  0x16   :  { %394 = vst [vmem:[%s1140_s3 + $0x60] sm:$0xff] %v322_v11  ;;  %v256_v32 = vadd.f32 %v670_v3, %v180_v24  ;;  %v257_v33 = vadd.f32 %v670_v3, %v181_v25  ;;  %v184_v34 = vmul.f32 %v665_v1, %v504_v26  ;;  %v185_v35 = vmul.f32 %v665_v1, %v505_v27  ;;  %v620_v25 = vld [vmem:[%s1137_s0 + $0x98] sm:$0xff]  }
  0x17   :  { %395 = vst [vmem:[%s1140_s3 + $0x68] sm:$0xff] %v323_v12  ;;  %v326_v37 = vmax.f32 %v254_v28, 0.0  ;;  %v327_v38 = vmax.f32 %v255_v29, 0.0  ;;  %v258_v39 = vadd.f32 %v670_v3, %v182_v30  ;;  %v259_v40 = vadd.f32 %v670_v3, %v183_v31 }
  0x18   :  { %396 = vst [vmem:[%s1140_s3 + $0x70] sm:$0xff] %v324_v16  ;;  %v328_v42 = vmax.f32 %v256_v32, 0.0  ;;  %v329_v43 = vmax.f32 %v257_v33, 0.0  ;;  %v260_v44 = vadd.f32 %v670_v3, %v184_v34  ;;  %v261_v45 = vadd.f32 %v670_v3, %v185_v35 }
  0x19   :  { %397 = vst [vmem:[%s1140_s3 + $0x78] sm:$0xff] %v325_v17  ;;  %v330_v47 = vmax.f32 %v258_v39, 0.0  ;;  %v331_v48 = vmax.f32 %v259_v40, 0.0  ;;  %v508_v49 = vunpack.c.l.bf16 %v613_v36  ;;  %v509_v50 = vunpack.c.h.bf16 %v613_v36 }
  0x1a   :  { %398 = vst [vmem:[%s1140_s3 + $0x80] sm:$0xff] %v326_v37  ;;  %v332_v52 = vmax.f32 %v260_v44, 0.0  ;;  %v333_v53 = vmax.f32 %v261_v45, 0.0  ;;  %v512_v54 = vunpack.c.l.bf16 %v614_v41  ;;  %v513_v55 = vunpack.c.h.bf16 %v614_v41 }
  0x1b   :  { %399 = vst [vmem:[%s1140_s3 + $0x88] sm:$0xff] %v327_v38  ;;  %v186_v56 = vmul.f32 %v665_v1, %v508_v49  ;;  %v187_v57 = vmul.f32 %v665_v1, %v509_v50  ;;  %v516_v58 = vunpack.c.l.bf16 %v615_v46  ;;  %v517_v59 = vunpack.c.h.bf16 %v615_v46  ;;  %v621_v46 = vld [vmem:[%s1137_s0 + $0xa0] sm:$0xff]  }
  0x1c   :  { %400 = vst [vmem:[%s1140_s3 + $0x90] sm:$0xff] %v328_v42  ;;  %v188_v60 = vmul.f32 %v665_v1, %v512_v54  ;;  %v189_v61 = vmul.f32 %v665_v1, %v513_v55  ;;  %v520_v62 = vunpack.c.l.bf16 %v616_v51  ;;  %v521_v63 = vunpack.c.h.bf16 %v616_v51  ;;  %v622_v51 = vld [vmem:[%s1137_s0 + $0xa8] sm:$0xff]  }
  0x1d   :  { %401 = vst [vmem:[%s1140_s3 + $0x98] sm:$0xff] %v329_v43  ;;  %v262_v0 = vadd.f32 %v670_v3, %v186_v56  ;;  %v263_v2 = vadd.f32 %v670_v3, %v187_v57  ;;  %v190_v4 = vmul.f32 %v665_v1, %v516_v58  ;;  %v191_v5 = vmul.f32 %v665_v1, %v517_v59  ;;  %v623_v56 = vld [vmem:[%s1137_s0 + $0xb0] sm:$0xff]  }
  0x1e   :  { %402 = vst [vmem:[%s1140_s3 + $0xa0] sm:$0xff] %v330_v47  ;;  %v264_v6 = vadd.f32 %v670_v3, %v188_v60  ;;  %v265_v7 = vadd.f32 %v670_v3, %v189_v61  ;;  %v192_v8 = vmul.f32 %v665_v1, %v520_v62  ;;  %v193_v9 = vmul.f32 %v665_v1, %v521_v63  ;;  %v624_v61 = vld [vmem:[%s1137_s0 + $0xb8] sm:$0xff]  }
  0x1f   :  { %403 = vst [vmem:[%s1140_s3 + $0xa8] sm:$0xff] %v331_v48  ;;  %v334_v11 = vmax.f32 %v262_v0, 0.0  ;;  %v335_v12 = vmax.f32 %v263_v2, 0.0  ;;  %v266_v13 = vadd.f32 %v670_v3, %v190_v4  ;;  %v267_v14 = vadd.f32 %v670_v3, %v191_v5 }
  0x20   :  { %404 = vst [vmem:[%s1140_s3 + $0xb0] sm:$0xff] %v332_v52  ;;  %v336_v16 = vmax.f32 %v264_v6, 0.0  ;;  %v337_v17 = vmax.f32 %v265_v7, 0.0  ;;  %v268_v18 = vadd.f32 %v670_v3, %v192_v8  ;;  %v269_v19 = vadd.f32 %v670_v3, %v193_v9 }
  0x21   :  { %405 = vst [vmem:[%s1140_s3 + $0xb8] sm:$0xff] %v333_v53  ;;  %v338_v21 = vmax.f32 %v266_v13, 0.0  ;;  %v339_v22 = vmax.f32 %v267_v14, 0.0  ;;  %v524_v23 = vunpack.c.l.bf16 %v617_v10  ;;  %v525_v24 = vunpack.c.h.bf16 %v617_v10 }
  0x22   :  { %406 = vst [vmem:[%s1140_s3 + $0xc0] sm:$0xff] %v334_v11  ;;  %v340_v26 = vmax.f32 %v268_v18, 0.0  ;;  %v341_v27 = vmax.f32 %v269_v19, 0.0  ;;  %v528_v28 = vunpack.c.l.bf16 %v618_v15  ;;  %v529_v29 = vunpack.c.h.bf16 %v618_v15 }
  0x23   :  { %407 = vst [vmem:[%s1140_s3 + $0xc8] sm:$0xff] %v335_v12  ;;  %v194_v30 = vmul.f32 %v665_v1, %v524_v23  ;;  %v195_v31 = vmul.f32 %v665_v1, %v525_v24  ;;  %v532_v32 = vunpack.c.l.bf16 %v619_v20  ;;  %v533_v33 = vunpack.c.h.bf16 %v619_v20  ;;  %v625_v20 = vld [vmem:[%s1137_s0 + $0xc0] sm:$0xff]  }
  0x24   :  { %408 = vst [vmem:[%s1140_s3 + $0xd0] sm:$0xff] %v336_v16  ;;  %v196_v34 = vmul.f32 %v665_v1, %v528_v28  ;;  %v197_v35 = vmul.f32 %v665_v1, %v529_v29  ;;  %v536_v36 = vunpack.c.l.bf16 %v620_v25  ;;  %v537_v37 = vunpack.c.h.bf16 %v620_v25  ;;  %v626_v25 = vld [vmem:[%s1137_s0 + $0xc8] sm:$0xff]  }
  0x25   :  { %409 = vst [vmem:[%s1140_s3 + $0xd8] sm:$0xff] %v337_v17  ;;  %v270_v38 = vadd.f32 %v670_v3, %v194_v30  ;;  %v271_v39 = vadd.f32 %v670_v3, %v195_v31  ;;  %v198_v40 = vmul.f32 %v665_v1, %v532_v32  ;;  %v199_v41 = vmul.f32 %v665_v1, %v533_v33  ;;  %v627_v30 = vld [vmem:[%s1137_s0 + $0xd0] sm:$0xff]  }
  0x26   :  { %410 = vst [vmem:[%s1140_s3 + $0xe0] sm:$0xff] %v338_v21  ;;  %v272_v42 = vadd.f32 %v670_v3, %v196_v34  ;;  %v273_v43 = vadd.f32 %v670_v3, %v197_v35  ;;  %v200_v44 = vmul.f32 %v665_v1, %v536_v36  ;;  %v201_v45 = vmul.f32 %v665_v1, %v537_v37  ;;  %v628_v35 = vld [vmem:[%s1137_s0 + $0xd8] sm:$0xff]  }
  0x27   :  { %411 = vst [vmem:[%s1140_s3 + $0xe8] sm:$0xff] %v339_v22  ;;  %v342_v47 = vmax.f32 %v270_v38, 0.0  ;;  %v343_v48 = vmax.f32 %v271_v39, 0.0  ;;  %v274_v49 = vadd.f32 %v670_v3, %v198_v40  ;;  %v275_v50 = vadd.f32 %v670_v3, %v199_v41 }
  0x28   :  { %412 = vst [vmem:[%s1140_s3 + $0xf0] sm:$0xff] %v340_v26  ;;  %v344_v52 = vmax.f32 %v272_v42, 0.0  ;;  %v345_v53 = vmax.f32 %v273_v43, 0.0  ;;  %v276_v54 = vadd.f32 %v670_v3, %v200_v44  ;;  %v277_v55 = vadd.f32 %v670_v3, %v201_v45 }
  0x29   :  { %413 = vst [vmem:[%s1140_s3 + $0xf8] sm:$0xff] %v341_v27  ;;  %v346_v57 = vmax.f32 %v274_v49, 0.0  ;;  %v347_v58 = vmax.f32 %v275_v50, 0.0  ;;  %v540_v59 = vunpack.c.l.bf16 %v621_v46  ;;  %v541_v60 = vunpack.c.h.bf16 %v621_v46 }
  0x2a   :  { %414 = vst [vmem:[%s1140_s3 + $0x100] sm:$0xff] %v342_v47  ;;  %v348_v62 = vmax.f32 %v276_v54, 0.0  ;;  %v349_v63 = vmax.f32 %v277_v55, 0.0  ;;  %v544_v0 = vunpack.c.l.bf16 %v622_v51  ;;  %v545_v2 = vunpack.c.h.bf16 %v622_v51 }
  0x2b   :  { %415 = vst [vmem:[%s1140_s3 + $0x108] sm:$0xff] %v343_v48  ;;  %v202_v4 = vmul.f32 %v665_v1, %v540_v59  ;;  %v203_v5 = vmul.f32 %v665_v1, %v541_v60  ;;  %v548_v6 = vunpack.c.l.bf16 %v623_v56  ;;  %v549_v7 = vunpack.c.h.bf16 %v623_v56  ;;  %v629_v56 = vld [vmem:[%s1137_s0 + $0xe0] sm:$0xff]  }
  0x2c   :  { %416 = vst [vmem:[%s1140_s3 + $0x110] sm:$0xff] %v344_v52  ;;  %v204_v8 = vmul.f32 %v665_v1, %v544_v0  ;;  %v205_v9 = vmul.f32 %v665_v1, %v545_v2  ;;  %v552_v10 = vunpack.c.l.bf16 %v624_v61  ;;  %v553_v11 = vunpack.c.h.bf16 %v624_v61  ;;  %v630_v61 = vld [vmem:[%s1137_s0 + $0xe8] sm:$0xff]  }
  0x2d   :  { %417 = vst [vmem:[%s1140_s3 + $0x118] sm:$0xff] %v345_v53  ;;  %v278_v12 = vadd.f32 %v670_v3, %v202_v4  ;;  %v279_v13 = vadd.f32 %v670_v3, %v203_v5  ;;  %v206_v14 = vmul.f32 %v665_v1, %v548_v6  ;;  %v207_v15 = vmul.f32 %v665_v1, %v549_v7  ;;  %v631_v4 = vld [vmem:[%s1137_s0 + $0xf0] sm:$0xff]  }
  0x2e   :  { %418 = vst [vmem:[%s1140_s3 + $0x120] sm:$0xff] %v346_v57  ;;  %v280_v16 = vadd.f32 %v670_v3, %v204_v8  ;;  %v281_v17 = vadd.f32 %v670_v3, %v205_v9  ;;  %v208_v18 = vmul.f32 %v665_v1, %v552_v10  ;;  %v209_v19 = vmul.f32 %v665_v1, %v553_v11  ;;  %v632_v9 = vld [vmem:[%s1137_s0 + $0xf8] sm:$0xff]  }
  0x2f   :  { %419 = vst [vmem:[%s1140_s3 + $0x128] sm:$0xff] %v347_v58  ;;  %v350_v21 = vmax.f32 %v278_v12, 0.0  ;;  %v351_v22 = vmax.f32 %v279_v13, 0.0  ;;  %v282_v23 = vadd.f32 %v670_v3, %v206_v14  ;;  %v283_v24 = vadd.f32 %v670_v3, %v207_v15 }
  0x30   :  { %420 = vst [vmem:[%s1140_s3 + $0x130] sm:$0xff] %v348_v62  ;;  %v352_v26 = vmax.f32 %v280_v16, 0.0  ;;  %v353_v27 = vmax.f32 %v281_v17, 0.0  ;;  %v284_v28 = vadd.f32 %v670_v3, %v208_v18  ;;  %v285_v29 = vadd.f32 %v670_v3, %v209_v19 }
  0x31   :  { %421 = vst [vmem:[%s1140_s3 + $0x138] sm:$0xff] %v349_v63  ;;  %v354_v31 = vmax.f32 %v282_v23, 0.0  ;;  %v355_v32 = vmax.f32 %v283_v24, 0.0  ;;  %v556_v33 = vunpack.c.l.bf16 %v625_v20  ;;  %v557_v34 = vunpack.c.h.bf16 %v625_v20 }
  0x32   :  { %422 = vst [vmem:[%s1140_s3 + $0x140] sm:$0xff] %v350_v21  ;;  %v356_v36 = vmax.f32 %v284_v28, 0.0  ;;  %v357_v37 = vmax.f32 %v285_v29, 0.0  ;;  %v560_v38 = vunpack.c.l.bf16 %v626_v25  ;;  %v561_v39 = vunpack.c.h.bf16 %v626_v25 }
  0x33   :  { %423 = vst [vmem:[%s1140_s3 + $0x148] sm:$0xff] %v351_v22  ;;  %v210_v40 = vmul.f32 %v665_v1, %v556_v33  ;;  %v211_v41 = vmul.f32 %v665_v1, %v557_v34  ;;  %v564_v42 = vunpack.c.l.bf16 %v627_v30  ;;  %v565_v43 = vunpack.c.h.bf16 %v627_v30  ;;  %v633_v30 = vld [vmem:[%s1137_s0 + $0x100] sm:$0xff]  }
  0x34   :  { %424 = vst [vmem:[%s1140_s3 + $0x150] sm:$0xff] %v352_v26  ;;  %v212_v44 = vmul.f32 %v665_v1, %v560_v38  ;;  %v213_v45 = vmul.f32 %v665_v1, %v561_v39  ;;  %v568_v46 = vunpack.c.l.bf16 %v628_v35  ;;  %v569_v47 = vunpack.c.h.bf16 %v628_v35  ;;  %v634_v35 = vld [vmem:[%s1137_s0 + $0x108] sm:$0xff]  }
  0x35   :  { %425 = vst [vmem:[%s1140_s3 + $0x158] sm:$0xff] %v353_v27  ;;  %v286_v48 = vadd.f32 %v670_v3, %v210_v40  ;;  %v287_v49 = vadd.f32 %v670_v3, %v211_v41  ;;  %v214_v50 = vmul.f32 %v665_v1, %v564_v42  ;;  %v215_v51 = vmul.f32 %v665_v1, %v565_v43  ;;  %v635_v40 = vld [vmem:[%s1137_s0 + $0x110] sm:$0xff]  }
  0x36   :  { %426 = vst [vmem:[%s1140_s3 + $0x160] sm:$0xff] %v354_v31  ;;  %v288_v52 = vadd.f32 %v670_v3, %v212_v44  ;;  %v289_v53 = vadd.f32 %v670_v3, %v213_v45  ;;  %v216_v54 = vmul.f32 %v665_v1, %v568_v46  ;;  %v217_v55 = vmul.f32 %v665_v1, %v569_v47  ;;  %v636_v45 = vld [vmem:[%s1137_s0 + $0x118] sm:$0xff]  }
  0x37   :  { %427 = vst [vmem:[%s1140_s3 + $0x168] sm:$0xff] %v355_v32  ;;  %v358_v57 = vmax.f32 %v286_v48, 0.0  ;;  %v359_v58 = vmax.f32 %v287_v49, 0.0  ;;  %v290_v59 = vadd.f32 %v670_v3, %v214_v50  ;;  %v291_v60 = vadd.f32 %v670_v3, %v215_v51 }
  0x38   :  { %428 = vst [vmem:[%s1140_s3 + $0x170] sm:$0xff] %v356_v36  ;;  %v360_v62 = vmax.f32 %v288_v52, 0.0  ;;  %v361_v63 = vmax.f32 %v289_v53, 0.0  ;;  %v292_v0 = vadd.f32 %v670_v3, %v216_v54  ;;  %v293_v2 = vadd.f32 %v670_v3, %v217_v55 }
  0x39   :  { %429 = vst [vmem:[%s1140_s3 + $0x178] sm:$0xff] %v357_v37  ;;  %v362_v5 = vmax.f32 %v290_v59, 0.0  ;;  %v363_v6 = vmax.f32 %v291_v60, 0.0  ;;  %v572_v7 = vunpack.c.l.bf16 %v629_v56  ;;  %v573_v8 = vunpack.c.h.bf16 %v629_v56 }
  0x3a   :  { %430 = vst [vmem:[%s1140_s3 + $0x180] sm:$0xff] %v358_v57  ;;  %v364_v10 = vmax.f32 %v292_v0, 0.0  ;;  %v365_v11 = vmax.f32 %v293_v2, 0.0  ;;  %v576_v12 = vunpack.c.l.bf16 %v630_v61  ;;  %v577_v13 = vunpack.c.h.bf16 %v630_v61 }
  0x3b   :  { %431 = vst [vmem:[%s1140_s3 + $0x188] sm:$0xff] %v359_v58  ;;  %v218_v14 = vmul.f32 %v665_v1, %v572_v7  ;;  %v219_v15 = vmul.f32 %v665_v1, %v573_v8  ;;  %v580_v16 = vunpack.c.l.bf16 %v631_v4  ;;  %v581_v17 = vunpack.c.h.bf16 %v631_v4 }
  0x3c   :  { %432 = vst [vmem:[%s1140_s3 + $0x190] sm:$0xff] %v360_v62  ;;  %v220_v18 = vmul.f32 %v665_v1, %v576_v12  ;;  %v221_v19 = vmul.f32 %v665_v1, %v577_v13  ;;  %v584_v20 = vunpack.c.l.bf16 %v632_v9  ;;  %v585_v21 = vunpack.c.h.bf16 %v632_v9 }
  0x3d   :  { %433 = vst [vmem:[%s1140_s3 + $0x198] sm:$0xff] %v361_v63  ;;  %v294_v22 = vadd.f32 %v670_v3, %v218_v14  ;;  %v295_v23 = vadd.f32 %v670_v3, %v219_v15  ;;  %v222_v24 = vmul.f32 %v665_v1, %v580_v16  ;;  %v223_v25 = vmul.f32 %v665_v1, %v581_v17 }
  0x3e   :  { %434 = vst [vmem:[%s1140_s3 + $0x1a0] sm:$0xff] %v362_v5  ;;  %v296_v26 = vadd.f32 %v670_v3, %v220_v18  ;;  %v297_v27 = vadd.f32 %v670_v3, %v221_v19  ;;  %v224_v28 = vmul.f32 %v665_v1, %v584_v20  ;;  %v225_v29 = vmul.f32 %v665_v1, %v585_v21 }
  0x3f   :  { %435 = vst [vmem:[%s1140_s3 + $0x1a8] sm:$0xff] %v363_v6  ;;  %v366_v31 = vmax.f32 %v294_v22, 0.0  ;;  %v367_v32 = vmax.f32 %v295_v23, 0.0  ;;  %v298_v33 = vadd.f32 %v670_v3, %v222_v24  ;;  %v299_v34 = vadd.f32 %v670_v3, %v223_v25 }
  0x40   :  { %436 = vst [vmem:[%s1140_s3 + $0x1b0] sm:$0xff] %v364_v10  ;;  %v368_v36 = vmax.f32 %v296_v26, 0.0  ;;  %v369_v37 = vmax.f32 %v297_v27, 0.0  ;;  %v300_v38 = vadd.f32 %v670_v3, %v224_v28  ;;  %v301_v39 = vadd.f32 %v670_v3, %v225_v29 }
  0x41   :  { %437 = vst [vmem:[%s1140_s3 + $0x1b8] sm:$0xff] %v365_v11  ;;  %v370_v41 = vmax.f32 %v298_v33, 0.0  ;;  %v371_v42 = vmax.f32 %v299_v34, 0.0  ;;  %v588_v43 = vunpack.c.l.bf16 %v633_v30  ;;  %v589_v44 = vunpack.c.h.bf16 %v633_v30 }
  0x42   :  { %438 = vst [vmem:[%s1140_s3 + $0x1c0] sm:$0xff] %v366_v31  ;;  %v372_v46 = vmax.f32 %v300_v38, 0.0  ;;  %v373_v47 = vmax.f32 %v301_v39, 0.0  ;;  %v592_v48 = vunpack.c.l.bf16 %v634_v35  ;;  %v593_v49 = vunpack.c.h.bf16 %v634_v35 }
  0x43   :  { %439 = vst [vmem:[%s1140_s3 + $0x1c8] sm:$0xff] %v367_v32  ;;  %v226_v50 = vmul.f32 %v665_v1, %v588_v43  ;;  %v227_v51 = vmul.f32 %v665_v1, %v589_v44  ;;  %v596_v52 = vunpack.c.l.bf16 %v635_v40  ;;  %v597_v53 = vunpack.c.h.bf16 %v635_v40 }
  0x44   :  { %440 = vst [vmem:[%s1140_s3 + $0x1d0] sm:$0xff] %v368_v36  ;;  %v228_v54 = vmul.f32 %v665_v1, %v592_v48  ;;  %v229_v55 = vmul.f32 %v665_v1, %v593_v49  ;;  %v600_v56 = vunpack.c.l.bf16 %v636_v45  ;;  %v601_v57 = vunpack.c.h.bf16 %v636_v45 }
  0x45   :  { %441 = vst [vmem:[%s1140_s3 + $0x1d8] sm:$0xff] %v369_v37  ;;  %v302_v58 = vadd.f32 %v670_v3, %v226_v50  ;;  %v303_v59 = vadd.f32 %v670_v3, %v227_v51  ;;  %v230_v60 = vmul.f32 %v665_v1, %v596_v52  ;;  %v231_v61 = vmul.f32 %v665_v1, %v597_v53 }
  0x46   :  { %442 = vst [vmem:[%s1140_s3 + $0x1e0] sm:$0xff] %v370_v41  ;;  %v304_v62 = vadd.f32 %v670_v3, %v228_v54  ;;  %v305_v63 = vadd.f32 %v670_v3, %v229_v55  ;;  %v232_v0 = vmul.f32 %v665_v1, %v600_v56  ;;  %v233_v2 = vmul.f32 %v665_v1, %v601_v57 }
  0x47   :  { %443 = vst [vmem:[%s1140_s3 + $0x1e8] sm:$0xff] %v371_v42  ;;  %v374_v4 = vmax.f32 %v302_v58, 0.0  ;;  %v375_v5 = vmax.f32 %v303_v59, 0.0  ;;  %v306_v6 = vadd.f32 %v670_v3, %v230_v60  ;;  %v307_v7 = vadd.f32 %v670_v3, %v231_v61 }
  0x48   :  { %444 = vst [vmem:[%s1140_s3 + $0x1f0] sm:$0xff] %v372_v46  ;;  %v376_v8 = vmax.f32 %v304_v62, 0.0  ;;  %v377_v9 = vmax.f32 %v305_v63, 0.0  ;;  %v308_v10 = vadd.f32 %v670_v3, %v232_v0  ;;  %v309_v1 = vadd.f32 %v670_v3, %v233_v2 }
  0x49   :  { %445 = vst [vmem:[%s1140_s3 + $0x1f8] sm:$0xff] %v373_v47  ;;  %v378_v11 = vmax.f32 %v306_v6, 0.0  ;;  %v379_v12 = vmax.f32 %v307_v7, 0.0 }
  0x4a   :  { %446 = vst [vmem:[%s1140_s3 + $0x200] sm:$0xff] %v374_v4  ;;  %v380_v13 = vmax.f32 %v308_v10, 0.0  ;;  %v381_v3 = vmax.f32 %v309_v1, 0.0 }
  0x4b   :  { %447 = vst [vmem:[%s1140_s3 + $0x208] sm:$0xff] %v375_v5 }
  0x4c   :  { %448 = vst [vmem:[%s1140_s3 + $0x210] sm:$0xff] %v376_v8 }
  0x4d   :  { %449 = vst [vmem:[%s1140_s3 + $0x218] sm:$0xff] %v377_v9 }
  0x4e   :  { %450 = vst [vmem:[%s1140_s3 + $0x220] sm:$0xff] %v378_v11 }
  0x4f   :  { %451 = vst [vmem:[%s1140_s3 + $0x228] sm:$0xff] %v379_v12 }
  0x50   :  { %452 = vst [vmem:[%s1140_s3 + $0x230] sm:$0xff] %v380_v13 }
  0x51   :  { %453 = vst [vmem:[%s1140_s3 + $0x238] sm:$0xff] %v381_v3 }

// kernel: cnn_layer_forward.3
= control target key start
LH: loop header
LB: loop body
LE: loop exit
PB: predicated region body
PF: predicated region fallthrough
CT: control target
= control target key end

     0   :  { %v4104_v52 = vlaneseq  ;;  %s4098_s1 = inlined_call_operand.vmem [shape: bf16[3,128,128], index: 1, kind: input, shape index: {}]   ;;  %s4099_s0 = inlined_call_operand.vmem [shape: bf16[576,128], index: 0, kind: input, shape index: {}]   ;;  %s4100_s2 = inlined_call_operand.vmem [shape: bf16[576,128], index: 2, kind: output, shape index: {0}]   ;;  %s4101_s3 = inlined_call_operand.vmem [shape: f32[1,128], index: 3, kind: output, shape index: {1}]   ;;  %s4102_s4 = inlined_call_operand.vmem [shape: f32[1,128], index: 4, kind: output, shape index: {2}]  }
   0x1   :  { %v2474_v0 = vld [vmem:[%s4098_s1 + $0x38] sm:$0xff]  ;;  %v2473_v3 = vld [vmem:[%s4098_s1 + $0x30] sm:$0xff]  ;;  %v2472_v6 = vld [vmem:[%s4098_s1 + $0x28] sm:$0xff] }
   0x2   :  { %v2482_v1 = vld [vmem:[%s4098_s1 + $0x78] sm:$0xff]  ;;  %366 = vmatpush.bf16.msra.mxu0 %v2474_v0  ;;  %2706 = vmatpush.bf16.msra.mxu3 %v2474_v0  ;;  %v2481_v4 = vld [vmem:[%s4098_s1 + $0x70] sm:$0xff]  ;;  %v2480_v7 = vld [vmem:[%s4098_s1 + $0x68] sm:$0xff]  ;;  %v2931_v57 = vshrl.u32 %v4104_v52, 7 }
   0x3   :  { %v2770_v2 = vld [vmem:[%s4098_s1 + $0xb8] sm:$0xff]  ;;  %620 = vmatpush.bf16.msra.mxu1 %v2482_v1  ;;  %v2782_v5 = vld [vmem:[%s4098_s1 + $0xb0] sm:$0xff]  ;;  %v2794_v8 = vld [vmem:[%s4098_s1 + $0xa8] sm:$0xff] }
   0x4   :  { %874 = vmatpush.bf16.msra.mxu2 %v2770_v2  ;;  %v2471_v9 = vld [vmem:[%s4098_s1 + $0x20] sm:$0xff]  ;;  %v2470_v12 = vld [vmem:[%s4098_s1 + $0x18] sm:$0xff]  ;;  %v2469_v15 = vld [vmem:[%s4098_s1 + $0x10] sm:$0xff]  ;;  %vm1137_vm0 = vcmp.lt.s32.totalorder %v2931_v57, 1  ;;  %vm1354_vm1 = vcmp.lt.s32.totalorder %v2931_v57, 7 }
   0x5   :  { %v2479_v10 = vld [vmem:[%s4098_s1 + $0x60] sm:$0xff]  ;;  %v2478_v13 = vld [vmem:[%s4098_s1 + $0x58] sm:$0xff]  ;;  %v2477_v16 = vld [vmem:[%s4098_s1 + $0x50] sm:$0xff] }
   0x6   :  { %367 = vmatpush.bf16.msra.mxu0 %v2473_v3  ;;  %2707 = vmatpush.bf16.msra.mxu3 %v2473_v3  ;;  %v2487_v11 = vld [vmem:[%s4098_s1 + $0xa0] sm:$0xff]  ;;  %v2486_v14 = vld [vmem:[%s4098_s1 + $0x98] sm:$0xff]  ;;  %v2485_v17 = vld [vmem:[%s4098_s1 + $0x90] sm:$0xff] }
   0x7   :  { %621 = vmatpush.bf16.msra.mxu1 %v2481_v4  ;;  %v2468_v18 = vld [vmem:[%s4098_s1 + $0x8] sm:$0xff]  ;;  %v2467_v21 = vld [vmem:[%s4098_s1] sm:$0xff]  ;;  %v2433_v28 = vld [vmem:[%s4099_s0 + $0x10] sm:$0xff] }
   0x8   :  { %875 = vmatpush.bf16.msra.mxu2 %v2782_v5  ;;  %v2476_v19 = vld [vmem:[%s4098_s1 + $0x48] sm:$0xff]  ;;  %v2475_v22 = vld [vmem:[%s4098_s1 + $0x40] sm:$0xff]  ;;  %v2866_v29 = vld [vmem:[%s4099_s0 + $0x110] sm:$0xff] }
   0x9   :  { %v2484_v20 = vld [vmem:[%s4098_s1 + $0x88] sm:$0xff]  ;;  %v2483_v23 = vld [vmem:[%s4098_s1 + $0x80] sm:$0xff]  ;;  %v2434_v30 = vld [vmem:[%s4099_s0 + $0x18] sm:$0xff] }
   0xa   :  { %368 = vmatpush.bf16.msra.mxu0 %v2472_v6  ;;  %2708 = vmatpush.bf16.msra.mxu3 %v2472_v6  ;;  %v2431_v24 = vld [vmem:[%s4099_s0] sm:$0xff]  ;;  %v2432_v26 = vld [vmem:[%s4099_s0 + $0x8] sm:$0xff]  ;;  %v2878_v31 = vld [vmem:[%s4099_s0 + $0x118] sm:$0xff] }
   0xb   :  { %622 = vmatpush.bf16.msra.mxu1 %v2480_v7  ;;  %v2848_v25 = vld [vmem:[%s4099_s0 + $0x100] sm:$0xff]  ;;  %v2857_v27 = vld [vmem:[%s4099_s0 + $0x108] sm:$0xff]  ;;  %v2437_v34 = vld [vmem:[%s4099_s0 + $0x30] sm:$0xff] }
   0xc   :  { %876 = vmatpush.bf16.msra.mxu2 %v2794_v8  ;;  %v2435_v32 = vld [vmem:[%s4099_s0 + $0x20] sm:$0xff]  ;;  %v2436_v33 = vld [vmem:[%s4099_s0 + $0x28] sm:$0xff]  ;;  %v2438_v35 = vld [vmem:[%s4099_s0 + $0x38] sm:$0xff] }
   0xd   :  { %v2439_v36 = vld [vmem:[%s4099_s0 + $0x40] sm:$0xff]  ;;  %v2440_v45 = vld [vmem:[%s4099_s0 + $0x48] sm:$0xff]  ;;  %v2441_v55 = vld [vmem:[%s4099_s0 + $0x50] sm:$0xff] }
   0xe   :  { %369 = vmatpush.bf16.msra.mxu0 %v2471_v9  ;;  %2709 = vmatpush.bf16.msra.mxu3 %v2471_v9 }
   0xf   :  { %623 = vmatpush.bf16.msra.mxu1 %v2479_v10 }
  0x10   :  { %877 = vmatpush.bf16.msra.mxu2 %v2487_v11 }
  0x12   :  { %370 = vmatpush.bf16.msra.mxu0 %v2470_v12  ;;  %2710 = vmatpush.bf16.msra.mxu3 %v2470_v12 }
  0x13   :  { %624 = vmatpush.bf16.msra.mxu1 %v2478_v13 }
  0x14   :  { %878 = vmatpush.bf16.msra.mxu2 %v2486_v14 }
  0x16   :  { %371 = vmatpush.bf16.msra.mxu0 %v2469_v15  ;;  %2711 = vmatpush.bf16.msra.mxu3 %v2469_v15 }
  0x17   :  { %625 = vmatpush.bf16.msra.mxu1 %v2477_v16 }
  0x18   :  { %879 = vmatpush.bf16.msra.mxu2 %v2485_v17 }
  0x1a   :  { %372 = vmatpush.bf16.msra.mxu0 %v2468_v18  ;;  %2712 = vmatpush.bf16.msra.mxu3 %v2468_v18 }
  0x1b   :  { %626 = vmatpush.bf16.msra.mxu1 %v2476_v19 }
  0x1c   :  { %880 = vmatpush.bf16.msra.mxu2 %v2484_v20 }
  0x1e   :  { %373 = vmatpush.bf16.msra.mxu0 %v2467_v21  ;;  %2713 = vmatpush.bf16.msra.mxu3 %v2467_v21 }
  0x1f   :  { %627 = vmatpush.bf16.msra.mxu1 %v2475_v22 }
  0x20   :  { %881 = vmatpush.bf16.msra.mxu2 %v2483_v23 }
  0x21   :  { %374 = vmatmul.bf16.vlgmr.msra.gmra.mxu0 %v2431_v24  ;;  %534 = vmatmul.bf16.vlgmr.msra.gmra.mxu3 %v2848_v25 }
  0x22   :  { %2714 = vmatpush.bf16.msrb.mxu3 %v2482_v1  ;;  %628 = vmatmul.bf16.vlgmr.msra.gmra.mxu1 %v2431_v24 }
  0x23   :  { %882 = vmatmul.bf16.vlgmr.msra.gmra.mxu2 %v2431_v24 }
  0x26   :  { %2715 = vmatpush.bf16.msrb.mxu3 %v2481_v4 }
  0x2a   :  { %2716 = vmatpush.bf16.msrb.mxu3 %v2480_v7 }
  0x2e   :  { %2717 = vmatpush.bf16.msrb.mxu3 %v2479_v10 }
  0x31   :  { %379 = vmatmul.bf16.gmra.mxu0 %v2432_v26  ;;  %539 = vmatmul.bf16.gmra.mxu3 %v2857_v27 }
  0x32   :  { %2718 = vmatpush.bf16.msrb.mxu3 %v2478_v13  ;;  %633 = vmatmul.bf16.gmra.mxu1 %v2432_v26 }
  0x33   :  { %887 = vmatmul.bf16.gmra.mxu2 %v2432_v26 }
  0x36   :  { %2719 = vmatpush.bf16.msrb.mxu3 %v2477_v16  ;;  %v2442_v16 = vld [vmem:[%s4099_s0 + $0x58] sm:$0xff] }
  0x3a   :  { %2720 = vmatpush.bf16.msrb.mxu3 %v2476_v19 }
  0x3e   :  { %2721 = vmatpush.bf16.msrb.mxu3 %v2475_v22 }
  0x41   :  { %384 = vmatmul.bf16.gmra.mxu0 %v2433_v28  ;;  %544 = vmatmul.bf16.gmra.mxu3 %v2866_v29 }
  0x42   :  { %2722 = vmatpush.bf16.msra.mxu3 %v2770_v2  ;;  %638 = vmatmul.bf16.gmra.mxu1 %v2433_v28 }
  0x43   :  { %892 = vmatmul.bf16.gmra.mxu2 %v2433_v28 }
  0x46   :  { %2723 = vmatpush.bf16.msra.mxu3 %v2782_v5 }
  0x4a   :  { %2724 = vmatpush.bf16.msra.mxu3 %v2794_v8 }
  0x4e   :  { %2725 = vmatpush.bf16.msra.mxu3 %v2487_v11 }
  0x51   :  { %389 = vmatmul.bf16.gmra.mxu0 %v2434_v30  ;;  %549 = vmatmul.bf16.gmra.mxu3 %v2878_v31 }
  0x52   :  { %2726 = vmatpush.bf16.msra.mxu3 %v2486_v14  ;;  %643 = vmatmul.bf16.gmra.mxu1 %v2434_v30 }
  0x53   :  { %897 = vmatmul.bf16.gmra.mxu2 %v2434_v30 }
  0x56   :  { %2727 = vmatpush.bf16.msra.mxu3 %v2485_v17 }
  0x5a   :  { %2728 = vmatpush.bf16.msra.mxu3 %v2484_v20 }
  0x5e   :  { %2729 = vmatpush.bf16.msra.mxu3 %v2483_v23 }
  0x61   :  { %394 = vmatmul.bf16.gmra.mxu0 %v2435_v32  ;;  %788 = vmatmul.bf16.vlgmr.msrb.gmra.mxu3 %v2848_v25 }
  0x62   :  { %648 = vmatmul.bf16.gmra.mxu1 %v2435_v32 }
  0x63   :  { %902 = vmatmul.bf16.gmra.mxu2 %v2435_v32 }
  0x71   :  { %399 = vmatmul.bf16.gmra.mxu0 %v2436_v33  ;;  %793 = vmatmul.bf16.gmra.mxu3 %v2857_v27 }
  0x72   :  { %653 = vmatmul.bf16.gmra.mxu1 %v2436_v33 }
  0x73   :  { %907 = vmatmul.bf16.gmra.mxu2 %v2436_v33 }
  0x81   :  { %404 = vmatmul.bf16.gmra.mxu0 %v2437_v34  ;;  %798 = vmatmul.bf16.gmra.mxu3 %v2866_v29 }
  0x82   :  { %658 = vmatmul.bf16.gmra.mxu1 %v2437_v34 }
  0x83   :  { %912 = vmatmul.bf16.gmra.mxu2 %v2437_v34 }
  0x91   :  { %409 = vmatmul.bf16.gmra.mxu0 %v2438_v35  ;;  %803 = vmatmul.bf16.gmra.mxu3 %v2878_v31 }
  0x92   :  { %663 = vmatmul.bf16.gmra.mxu1 %v2438_v35 }
  0x93   :  { %917 = vmatmul.bf16.gmra.mxu2 %v2438_v35 }
  0x9e   :  { %v2900_v37 = vpop.f32.mrf.mxu0 }
  0x9f   :  { %v2902_v38 = vpop.f32.mrf.mxu1  ;;  %v1063_v35 = vrot.slane %v2900_v37, 7 }
  0xa1   :  { %414 = vmatmul.bf16.gmra.mxu0 %v2439_v36  ;;  %1042 = vmatmul.bf16.vlgmr.msra.gmra.mxu3 %v2848_v25 }
  0xa2   :  { %668 = vmatmul.bf16.gmra.mxu1 %v2439_v36 }
  0xa3   :  { %922 = vmatmul.bf16.gmra.mxu2 %v2439_v36 }
  0xa4   :  { %v2905_v39 = vpop.f32.mrf.mxu3 }
  0xa6   :  { %v2907_v40 = vpop.f32.mrf.mxu2  ;;  %v2909_v41 = vpop.f32.mrf.mxu0 }
  0xa7   :  { %v2911_v42 = vpop.f32.mrf.mxu1  ;;  %v1064_v61 = vrot.slane %v2909_v41, 7 }
  0xac   :  { %v2913_v43 = vpop.f32.mrf.mxu3 }
  0xae   :  { %v2915_v44 = vpop.f32.mrf.mxu2  ;;  %v380_v46 = vpop.f32.mrf.mxu0 }
  0xaf   :  { %v634_v47 = vpop.f32.mrf.mxu1  ;;  %v1065_v59 = vrot.slane %v380_v46, 7  ;;  %v1283_v46 = vrot.slane %v2915_v44, 1 }
  0xb1   :  { %419 = vmatmul.bf16.gmra.mxu0 %v2440_v45  ;;  %1047 = vmatmul.bf16.gmra.mxu3 %v2857_v27  ;;  %v1207_v63 = vsel %vm1137_vm0, %v1064_v61, %v1065_v59 }
  0xb2   :  { %673 = vmatmul.bf16.gmra.mxu1 %v2440_v45  ;;  %v1212_v7 = vadd.f32 %v1207_v63, %v634_v47 }
  0xb3   :  { %927 = vmatmul.bf16.gmra.mxu2 %v2440_v45  ;;  %v1208_v45 = vsel %vm1137_vm0, %v1063_v35, %v1064_v61 }
  0xb4   :  { %v2921_v48 = vpop.f32.mrf.mxu3 }
  0xb6   :  { %v2923_v49 = vpop.f32.mrf.mxu2  ;;  %v382_v50 = vpop.f32.mrf.mxu0 }
  0xb7   :  { %v636_v51 = vpop.f32.mrf.mxu1  ;;  %v1066_v60 = vrot.slane %v382_v50, 7  ;;  %v1284_v0 = vrot.slane %v2923_v49, 1  ;;  %v2443_v50 = vld [vmem:[%s4099_s0 + $0x60] sm:$0xff] }
  0xb9   :  { %v1206_v1 = vsel %vm1137_vm0, %v1065_v59, %v1066_v60 }
  0xba   :  { %v1213_v8 = vadd.f32 %v1206_v1, %v636_v51  ;;  %v4105_v51 = vrot.slane %v2907_v40, 1 }
  0xbc   :  { %v2925_v53 = vpop.f32.mrf.mxu3  ;;  %v1425_v61 = vsel %vm1354_vm1, %v4105_v51, %v1283_v46 }
  0xbe   :  { %v890_v54 = vpop.f32.mrf.mxu2  ;;  %v385_v56 = vpop.f32.mrf.mxu0 }
  0xbf   :  { %v639_v58 = vpop.f32.mrf.mxu1  ;;  %v1285_v62 = vrot.slane %v890_v54, 1  ;;  %v1067_v19 = vrot.slane %v385_v56, 7  ;;  %v1211_v56 = vadd.f32 %v1208_v45, %v2911_v42 }
  0xc1   :  { %424 = vmatmul.bf16.gmra.mxu0 %v2441_v55  ;;  %1052 = vmatmul.bf16.gmra.mxu3 %v2866_v29  ;;  %v1423_v6 = vsel %vm1354_vm1, %v1284_v0, %v1285_v62  ;;  %v1205_v22 = vsel %vm1137_vm0, %v1066_v60, %v1067_v19 }
  0xc2   :  { %678 = vmatmul.bf16.gmra.mxu1 %v2441_v55  ;;  %v2952_v12 = vadd.f32 %v1423_v6, %v1212_v7  ;;  %v1214_v29 = vadd.f32 %v1205_v22, %v639_v58 }
  0xc3   :  { %932 = vmatmul.bf16.gmra.mxu2 %v2441_v55  ;;  %v1424_v55 = vsel %vm1354_vm1, %v1283_v46, %v1284_v0 }
  0xc4   :  { %v2941_v2 = vpop.f32.mrf.mxu3  ;;  %4159 = vst [vmem:[#allocation3_spill] sm:$0xff] %v2952_v12  ;;  %v3011_v63 = vadd.f32 %v1424_v55, %v1211_v56 }
  0xc6   :  { %v893_v3 = vpop.f32.mrf.mxu2  ;;  %v2944_v5 = vpop.f32.mrf.mxu0  ;;  %4162 = vst [vmem:[#allocation6_spill] sm:$0xff] %v3011_v63 }
  0xc7   :  { %v1286_v4 = vrot.slane %v893_v3, 1  ;;  %v641_v9 = vpop.f32.mrf.mxu1  ;;  %v1068_v20 = vrot.slane %v2944_v5, 7 }
  0xc9   :  { %v1422_v10 = vsel %vm1354_vm1, %v1285_v62, %v1286_v4  ;;  %v1204_v23 = vsel %vm1137_vm0, %v1067_v19, %v1068_v20 }
  0xca   :  { %v2950_v11 = vadd.f32 %v1422_v10, %v1213_v8  ;;  %v1215_v30 = vadd.f32 %v1204_v23, %v641_v9 }
  0xcc   :  { %4158 = vst [vmem:[#allocation2_spill] sm:$0xff] %v2950_v11  ;;  %v2499_v13 = vpack.c.bf16 %v2950_v11, %v2952_v12  ;;  %v2956_v14 = vpop.f32.mrf.mxu3 }
  0xce   :  { %v895_v15 = vpop.f32.mrf.mxu2  ;;  %2671 = vst [vmem:[%s4100_s2 + $0x8] sm:$0xff] %v2499_v13   ;;  %v390_v17 = vpop.f32.mrf.mxu0 }
  0xcf   :  { %v644_v18 = vpop.f32.mrf.mxu1  ;;  %v1287_v21 = vrot.slane %v895_v15, 1  ;;  %v1069_v58 = vrot.slane %v390_v17, 7 }
  0xd1   :  { %429 = vmatmul.bf16.gmra.mxu0 %v2442_v16  ;;  %1057 = vmatmul.bf16.gmra.mxu3 %v2878_v31  ;;  %v1421_v28 = vsel %vm1354_vm1, %v1286_v4, %v1287_v21  ;;  %v1203_v42 = vsel %vm1137_vm0, %v1068_v20, %v1069_v58 }
  0xd2   :  { %683 = vmatmul.bf16.gmra.mxu1 %v2442_v16  ;;  %v2980_v34 = vadd.f32 %v1421_v28, %v1214_v29  ;;  %v1216_v8 = vadd.f32 %v1203_v42, %v644_v18 }
  0xd3   :  { %937 = vmatmul.bf16.gmra.mxu2 %v2442_v16 }
  0xd4   :  { %v2970_v24 = vpop.f32.mrf.mxu3  ;;  %4161 = vst [vmem:[#allocation5_spill] sm:$0xff] %v2980_v34 }
  0xd6   :  { %v898_v25 = vpop.f32.mrf.mxu2  ;;  %v2972_v27 = vpop.f32.mrf.mxu0 }
  0xd7   :  { %v1288_v26 = vrot.slane %v898_v25, 1  ;;  %v646_v31 = vpop.f32.mrf.mxu1  ;;  %v1070_v59 = vrot.slane %v2972_v27, 7 }
  0xd9   :  { %v1420_v32 = vsel %vm1354_vm1, %v1287_v21, %v1288_v26  ;;  %v1202_v0 = vsel %vm1137_vm0, %v1069_v58, %v1070_v59  ;;  %v2444_v21 = vld [vmem:[%s4099_s0 + $0x68] sm:$0xff]  ;;  %v2445_v58 = vld [vmem:[%s4099_s0 + $0x70] sm:$0xff] }
  0xda   :  { %v2978_v33 = vadd.f32 %v1420_v32, %v1215_v30  ;;  %v1217_v9 = vadd.f32 %v1202_v0, %v646_v31 }
  0xdc   :  { %4160 = vst [vmem:[#allocation4_spill] sm:$0xff] %v2978_v33  ;;  %v2504_v36 = vpack.c.bf16 %v2978_v33, %v2980_v34  ;;  %v2985_v41 = vpop.f32.mrf.mxu3 }
  0xdd   :  { %v1134_v47 = vrot.slane %v2985_v41, 7 }
  0xde   :  { %v900_v49 = vpop.f32.mrf.mxu2  ;;  %2672 = vst [vmem:[%s4100_s2 + $0x10] sm:$0xff] %v2504_v36   ;;  %v395_v37 = vpop.f32.mrf.mxu0 }
  0xdf   :  { %v1209_v54 = vsel %vm1137_vm0, %v1134_v47, %v1063_v35  ;;  %v649_v44 = vpop.f32.mrf.mxu1  ;;  %v1289_v62 = vrot.slane %v900_v49, 1  ;;  %v1071_v23 = vrot.slane %v395_v37, 7 }
  0xe0   :  { %v1210_v60 = vadd.f32 %v1209_v54, %v2902_v38 }
  0xe1   :  { %434 = vmatmul.bf16.gmra.mxu0 %v2443_v50  ;;  %v1419_v7 = vsel %vm1354_vm1, %v1288_v26, %v1289_v62  ;;  %v1201_v27 = vsel %vm1137_vm0, %v1070_v59, %v1071_v23 }
  0xe2   :  { %688 = vmatmul.bf16.gmra.mxu1 %v2443_v50  ;;  %v3013_v1 = vadd.f32 %v1425_v61, %v1210_v60  ;;  %v3032_v16 = vadd.f32 %v1419_v7, %v1216_v8  ;;  %v1218_v36 = vadd.f32 %v1201_v27, %v649_v44 }
  0xe3   :  { %942 = vmatmul.bf16.gmra.mxu2 %v2443_v50 }
  0xe4   :  { %4163 = vst [vmem:[#allocation7_spill] sm:$0xff] %v3013_v1  ;;  %v3019_v38 = vpop.f32.mrf.mxu3  ;;  %v2494_v3 = vpack.c.bf16 %v3011_v63, %v3013_v1 }
  0xe5   :  { %4165 = vst [vmem:[#allocation9_spill] sm:$0xff] %v3032_v16 }
  0xe6   :  { %v903_v4 = vpop.f32.mrf.mxu2  ;;  %v397_v6 = vpop.f32.mrf.mxu0  ;;  %2495 = vst [vmem:[%s4100_s2] sm:$0xff] %v2494_v3  }
  0xe7   :  { %v1290_v5 = vrot.slane %v903_v4, 1  ;;  %v651_v10 = vpop.f32.mrf.mxu1  ;;  %v1072_v25 = vrot.slane %v397_v6, 7 }
  0xe9   :  { %v1418_v13 = vsel %vm1354_vm1, %v1289_v62, %v1290_v5  ;;  %v1200_v28 = vsel %vm1137_vm0, %v1071_v23, %v1072_v25 }
  0xea   :  { %v3030_v15 = vadd.f32 %v1418_v13, %v1217_v9  ;;  %v1219_v45 = vadd.f32 %v1200_v28, %v651_v10  ;;  %v2446_v28 = vld [vmem:[%s4099_s0 + $0x78] sm:$0xff] }
  0xec   :  { %4164 = vst [vmem:[#allocation8_spill] sm:$0xff] %v3030_v15  ;;  %v2509_v17 = vpack.c.bf16 %v3030_v15, %v3032_v16  ;;  %v3036_v19 = vpop.f32.mrf.mxu3 }
  0xee   :  { %v905_v20 = vpop.f32.mrf.mxu2  ;;  %2673 = vst [vmem:[%s4100_s2 + $0x18] sm:$0xff] %v2509_v17   ;;  %v400_v18 = vpop.f32.mrf.mxu0  ;;  %v4106_v17 = vrot.slane %v2956_v14, 7 }
  0xef   :  { %v654_v22 = vpop.f32.mrf.mxu1  ;;  %v1291_v26 = vrot.slane %v905_v20, 1  ;;  %v1073_v60 = vrot.slane %v400_v18, 7 }
  0xf1   :  { %439 = vmatmul.bf16.gmra.mxu0 %v2444_v21  ;;  %v1417_v35 = vsel %vm1354_vm1, %v1290_v5, %v1291_v26  ;;  %v1199_v42 = vsel %vm1137_vm0, %v1072_v25, %v1073_v60  ;;  %v4103_v5 = vrot.slane %v2941_v2, 7 }
  0xf2   :  { %693 = vmatmul.bf16.gmra.mxu1 %v2444_v21  ;;  %v3056_v37 = vadd.f32 %v1417_v35, %v1218_v36  ;;  %v1220_v9 = vadd.f32 %v1199_v42, %v654_v22 }
  0xf3   :  { %947 = vmatmul.bf16.gmra.mxu2 %v2444_v21  ;;  %v1140_v23 = vsel %vm1137_vm0, %v4103_v5, %v4106_v17 }
  0xf4   :  { %v3048_v29 = vpop.f32.mrf.mxu3 }
  0xf6   :  { %v908_v30 = vpop.f32.mrf.mxu2  ;;  %v402_v32 = vpop.f32.mrf.mxu0 }
  0xf7   :  { %v1292_v31 = vrot.slane %v908_v30, 1  ;;  %v656_v46 = vpop.f32.mrf.mxu1  ;;  %v1074_v61 = vrot.slane %v402_v32, 7 }
  0xf9   :  { %v1416_v49 = vsel %vm1354_vm1, %v1291_v26, %v1292_v31  ;;  %v1198_v0 = vsel %vm1137_vm0, %v1073_v60, %v1074_v61 }
  0xfa   :  { %v3054_v50 = vadd.f32 %v1416_v49, %v1219_v45  ;;  %v1221_v10 = vadd.f32 %v1198_v0, %v656_v46 }
  0xfc   :  { %v2514_v54 = vpack.c.bf16 %v3054_v50, %v3056_v37  ;;  %v3060_v55 = vpop.f32.mrf.mxu3 }
  0xfe   :  { %v910_v56 = vpop.f32.mrf.mxu2  ;;  %2674 = vst [vmem:[%s4100_s2 + $0x20] sm:$0xff] %v2514_v54   ;;  %v405_v44 = vpop.f32.mrf.mxu0 }
  0xff   :  { %v659_v59 = vpop.f32.mrf.mxu1  ;;  %v1293_v62 = vrot.slane %v910_v56, 1  ;;  %v1075_v32 = vrot.slane %v405_v44, 7  ;;  %v4107_v56 = vrot.slane %v2970_v24, 7 }
 0x101   :  { %444 = vmatmul.bf16.gmra.mxu0 %v2445_v58  ;;  %v1415_v8 = vsel %vm1354_vm1, %v1292_v31, %v1293_v62  ;;  %v1197_v45 = vsel %vm1137_vm0, %v1074_v61, %v1075_v32 }
 0x102   :  { %698 = vmatmul.bf16.gmra.mxu1 %v2445_v58  ;;  %v3082_v18 = vadd.f32 %v1415_v8, %v1220_v9  ;;  %v1138_v8 = vsel %vm1137_vm0, %v4107_v56, %v1134_v47 }
 0x103   :  { %952 = vmatmul.bf16.gmra.mxu2 %v2445_v58 }
 0x104   :  { %v3072_v3 = vpop.f32.mrf.mxu3 }
 0x106   :  { %v913_v4 = vpop.f32.mrf.mxu2  ;;  %v407_v7 = vpop.f32.mrf.mxu0 }
 0x107   :  { %v1294_v6 = vrot.slane %v913_v4, 1  ;;  %v661_v13 = vpop.f32.mrf.mxu1  ;;  %v1076_v35 = vrot.slane %v407_v7, 7 }
 0x109   :  { %v1414_v20 = vsel %vm1354_vm1, %v1293_v62, %v1294_v6  ;;  %v1196_v46 = vsel %vm1137_vm0, %v1075_v32, %v1076_v35  ;;  %v1222_v62 = vadd.f32 %v1197_v45, %v659_v59 }
 0x10a   :  { %v3080_v21 = vadd.f32 %v1414_v20, %v1221_v10  ;;  %v1223_v42 = vadd.f32 %v1196_v46, %v661_v13  ;;  %v2447_v13 = vld [vmem:[%s4099_s0 + $0x80] sm:$0xff] }
 0x10c   :  { %v2519_v22 = vpack.c.bf16 %v3080_v21, %v3082_v18  ;;  %v801_v25 = vpop.f32.mrf.mxu3 }
 0x10d   :  { %v3092_v26 = vadd.f32 %v1140_v23, %v801_v25 }
 0x10e   :  { %v915_v27 = vpop.f32.mrf.mxu2  ;;  %2675 = vst [vmem:[%s4100_s2 + $0x28] sm:$0xff] %v2519_v22   ;;  %v410_v30 = vpop.f32.mrf.mxu0 }
 0x10f   :  { %v664_v31 = vpop.f32.mrf.mxu1  ;;  %v1295_v36 = vrot.slane %v915_v27, 1  ;;  %v1077_v23 = vrot.slane %v410_v30, 7 }
 0x111   :  { %449 = vmatmul.bf16.gmra.mxu0 %v2446_v28  ;;  %v1413_v44 = vsel %vm1354_vm1, %v1294_v6, %v1295_v36  ;;  %v1195_v25 = vsel %vm1137_vm0, %v1076_v35, %v1077_v23 }
 0x112   :  { %703 = vmatmul.bf16.gmra.mxu1 %v2446_v28  ;;  %v3113_v7 = vadd.f32 %v1413_v44, %v1222_v62  ;;  %v1224_v30 = vadd.f32 %v1195_v25, %v664_v31  ;;  %v2448_v31 = vld [vmem:[%s4099_s0 + $0x88] sm:$0xff] }
 0x113   :  { %957 = vmatmul.bf16.gmra.mxu2 %v2446_v28 }
 0x114   :  { %v3104_v49 = vpop.f32.mrf.mxu3 }
 0x116   :  { %v918_v54 = vpop.f32.mrf.mxu2  ;;  %v412_v60 = vpop.f32.mrf.mxu0 }
 0x117   :  { %v1296_v58 = vrot.slane %v918_v54, 1  ;;  %v666_v0 = vpop.f32.mrf.mxu1  ;;  %v1078_v22 = vrot.slane %v412_v60, 7 }
 0x119   :  { %v1412_v4 = vsel %vm1354_vm1, %v1295_v36, %v1296_v58  ;;  %v1194_v27 = vsel %vm1137_vm0, %v1077_v23, %v1078_v22 }
 0x11a   :  { %v3111_v61 = vadd.f32 %v1412_v4, %v1223_v42  ;;  %v1225_v54 = vadd.f32 %v1194_v27, %v666_v0 }
 0x11c   :  { %v2524_v6 = vpack.c.bf16 %v3111_v61, %v3113_v7  ;;  %v806_v59 = vpop.f32.mrf.mxu3 }
 0x11d   :  { %v3123_v9 = vadd.f32 %v1138_v8, %v806_v59 }
 0x11e   :  { %v920_v10 = vpop.f32.mrf.mxu2  ;;  %2676 = vst [vmem:[%s4100_s2 + $0x30] sm:$0xff] %v2524_v6   ;;  %v415_v41 = vpop.f32.mrf.mxu0 }
 0x11f   :  { %v669_v20 = vpop.f32.mrf.mxu1  ;;  %v1297_v47 = vrot.slane %v920_v10, 1  ;;  %v1079_v6 = vrot.slane %v415_v41, 7 }
 0x121   :  { %454 = vmatmul.bf16.gmra.mxu0 %v2447_v13  ;;  %v1411_v46 = vsel %vm1354_vm1, %v1296_v58, %v1297_v47 }
 0x122   :  { %708 = vmatmul.bf16.gmra.mxu1 %v2447_v13  ;;  %v3143_v35 = vadd.f32 %v1411_v46, %v1224_v30 }
 0x123   :  { %962 = vmatmul.bf16.gmra.mxu2 %v2447_v13  ;;  %v1193_v13 = vsel %vm1137_vm0, %v1078_v22, %v1079_v6 }
 0x124   :  { %v3135_v28 = vpop.f32.mrf.mxu3 }
 0x126   :  { %v923_v32 = vpop.f32.mrf.mxu2  ;;  %v417_v45 = vpop.f32.mrf.mxu0 }
 0x127   :  { %v1298_v36 = vrot.slane %v923_v32, 1  ;;  %v671_v60 = vpop.f32.mrf.mxu1  ;;  %v1080_v59 = vrot.slane %v417_v45, 7  ;;  %v1226_v45 = vadd.f32 %v1193_v13, %v669_v20 }
 0x129   :  { %v1410_v44 = vsel %vm1354_vm1, %v1297_v47, %v1298_v36  ;;  %v1192_v23 = vsel %vm1137_vm0, %v1079_v6, %v1080_v59 }
 0x12a   :  { %v3141_v62 = vadd.f32 %v1410_v44, %v1225_v54  ;;  %v1227_v46 = vadd.f32 %v1192_v23, %v671_v60  ;;  %v2449_v60 = vld [vmem:[%s4099_s0 + $0x90] sm:$0xff] }
 0x12c   :  { %1855 = vmatpush.msrb.mxu3 %v3141_v62  ;;  %v2529_v42 = vpack.c.bf16 %v3141_v62, %v3143_v35  ;;  %v3148_v4 = vpop.f32.mrf.mxu3 }
 0x12e   :  { %v925_v8 = vpop.f32.mrf.mxu2  ;;  %2677 = vst [vmem:[%s4100_s2 + $0x38] sm:$0xff] %v2529_v42   ;;  %1856 = vmatpush.msrb.mxu3 %v3143_v35  ;;  %v420_v58 = vpop.f32.mrf.mxu0 }
 0x12f   :  { %v674_v0 = vpop.f32.mrf.mxu1  ;;  %v1299_v10 = vrot.slane %v925_v8, 1  ;;  %v1081_v6 = vrot.slane %v420_v58, 7 }
 0x130   :  { %1857 = vmatpush.msrb.mxu3 %v3111_v61 }
 0x131   :  { %459 = vmatmul.bf16.gmra.mxu0 %v2448_v31  ;;  %v1409_v32 = vsel %vm1354_vm1, %v1298_v36, %v1299_v10  ;;  %v1191_v23 = vsel %vm1137_vm0, %v1080_v59, %v1081_v6 }
 0x132   :  { %1858 = vmatpush.msrb.mxu3 %v3113_v7  ;;  %713 = vmatmul.bf16.gmra.mxu1 %v2448_v31  ;;  %v3175_v44 = vadd.f32 %v1409_v32, %v1226_v45 }
 0x133   :  { %967 = vmatmul.bf16.gmra.mxu2 %v2448_v31 }
 0x134   :  { %1859 = vmatpush.msrb.mxu3 %v3080_v21  ;;  %v3164_v47 = vpop.f32.mrf.mxu3  ;;  %4167 = vst [vmem:[#allocation11_spill] sm:$0xff] %v3175_v44 }
 0x136   :  { %v928_v25 = vpop.f32.mrf.mxu2  ;;  %1860 = vmatpush.msrb.mxu3 %v3082_v18  ;;  %v422_v27 = vpop.f32.mrf.mxu0 }
 0x137   :  { %v1300_v41 = vrot.slane %v928_v25, 1  ;;  %v676_v30 = vpop.f32.mrf.mxu1 }
 0x138   :  { %1861 = vmatpush.msrb.mxu3 %v3054_v50 }
 0x139   :  { %v1408_v22 = vsel %vm1354_vm1, %v1299_v10, %v1300_v41  ;;  %v1082_v10 = vrot.slane %v422_v27, 7 }
 0x13a   :  { %1862 = vmatpush.msrb.mxu3 %v3056_v37  ;;  %v3173_v54 = vadd.f32 %v1408_v22, %v1227_v46  ;;  %v1228_v22 = vadd.f32 %v1191_v23, %v674_v0  ;;  %v2450_v0 = vld [vmem:[%s4099_s0 + $0x98] sm:$0xff] }
 0x13b   :  { %v1190_v25 = vsel %vm1137_vm0, %v1081_v6, %v1082_v10 }
 0x13c   :  { %4166 = vst [vmem:[#allocation10_spill] sm:$0xff] %v3173_v54  ;;  %1863 = vmatpush.msrb.mxu3 %v3030_v15  ;;  %v2534_v42 = vpack.c.bf16 %v3173_v54, %v3175_v44  ;;  %v3180_v36 = vpop.f32.mrf.mxu3 }
 0x13e   :  { %v930_v20 = vpop.f32.mrf.mxu2  ;;  %1864 = vmatpush.msrb.mxu3 %v3032_v16  ;;  %2678 = vst [vmem:[%s4100_s2 + $0x40] sm:$0xff] %v2534_v42   ;;  %v425_v8 = vpop.f32.mrf.mxu0  ;;  %v1229_v42 = vadd.f32 %v1190_v25, %v676_v30 }
 0x13f   :  { %v679_v31 = vpop.f32.mrf.mxu1  ;;  %v1301_v13 = vrot.slane %v930_v20, 1  ;;  %v1083_v23 = vrot.slane %v425_v8, 7 }
 0x140   :  { %1865 = vmatpush.msrb.mxu3 %v2978_v33 }
 0x141   :  { %464 = vmatmul.bf16.gmra.mxu0 %v2449_v60  ;;  %v1407_v46 = vsel %vm1354_vm1, %v1300_v41, %v1301_v13 }
 0x142   :  { %1866 = vmatpush.msrb.mxu3 %v2980_v34  ;;  %718 = vmatmul.bf16.gmra.mxu1 %v2449_v60  ;;  %v3207_v6 = vadd.f32 %v1407_v46, %v1228_v22  ;;  %v1189_v22 = vsel %vm1137_vm0, %v1082_v10, %v1083_v23  ;;  %v4171_v10 = vrot.slane %v2956_v14, 7  ;;  %v2451_v14 = vld [vmem:[%s4099_s0 + $0xa0] sm:$0xff] }
 0x143   :  { %972 = vmatmul.bf16.gmra.mxu2 %v2449_v60  ;;  %v1230_v8 = vadd.f32 %v1189_v22, %v679_v31 }
 0x144   :  { %1867 = vmatpush.msrb.mxu3 %v2950_v11  ;;  %v3196_v32 = vpop.f32.mrf.mxu3  ;;  %4169 = vst [vmem:[#allocation13_spill] sm:$0xff] %v3207_v6 }
 0x146   :  { %v933_v45 = vpop.f32.mrf.mxu2  ;;  %1868 = vmatpush.msrb.mxu3 %v2952_v12  ;;  %v427_v27 = vpop.f32.mrf.mxu0 }
 0x147   :  { %v1302_v58 = vrot.slane %v933_v45, 1  ;;  %v681_v20 = vpop.f32.mrf.mxu1  ;;  %v1084_v25 = vrot.slane %v427_v27, 7 }
 0x148   :  { %1869 = vmatpush.msrb.mxu3 %v3011_v63 }
 0x149   :  { %v1406_v59 = vsel %vm1354_vm1, %v1301_v13, %v1302_v58 }
 0x14a   :  { %1870 = vmatpush.msrb.mxu3 %v3013_v1  ;;  %v3205_v60 = vadd.f32 %v1406_v59, %v1229_v42  ;;  %v1188_v42 = vsel %vm1137_vm0, %v1083_v23, %v1084_v25 }
 0x14b   :  { %v1231_v27 = vadd.f32 %v1188_v42, %v681_v20  ;;  %v4174_v42 = vrot.slane %v2907_v40, 1 }
 0x14c   :  { %4168 = vst [vmem:[#allocation12_spill] sm:$0xff] %v3205_v60  ;;  %v2539_v45 = vpack.c.bf16 %v3205_v60, %v3207_v6  ;;  %v3211_v5 = vpop.f32.mrf.mxu3 }
 0x14e   :  { %v935_v41 = vpop.f32.mrf.mxu2  ;;  %2679 = vst [vmem:[%s4100_s2 + $0x48] sm:$0xff] %v2539_v45   ;;  %v430_v30 = vpop.f32.mrf.mxu0 }
 0x14f   :  { %v684_v13 = vpop.f32.mrf.mxu1  ;;  %v1303_v46 = vrot.slane %v935_v41, 1 }
 0x151   :  { %469 = vmatmul.bf16.gmra.mxu0 %v2450_v0  ;;  %v1405_v45 = vsel %vm1354_vm1, %v1302_v58, %v1303_v46 }
 0x152   :  { %723 = vmatmul.bf16.gmra.mxu1 %v2450_v0 }
 0x153   :  { %977 = vmatmul.bf16.gmra.mxu2 %v2450_v0  ;;  %v4170_v0 = vrot.slane %v2970_v24, 7 }
 0x154   :  { %v3223_v59 = vpop.f32.mrf.mxu3 }
 0x155   :  { %v1139_v23 = vsel %vm1137_vm0, %v4171_v10, %v4170_v0  ;;  %v4110_v63 = vrot.slane %v3223_v59, 1 }
 0x156   :  { %v938_v52 = vpop.f32.mrf.mxu2  ;;  %v432_v17 = vpop.f32.mrf.mxu0  ;;  %v1280_v58 = vadd.f32 %v1139_v23, %v3104_v49 }
 0x157   :  { %v1304_v51 = vrot.slane %v938_v52, 1  ;;  %v686_v56 = vpop.f32.mrf.mxu1  ;;  %v3237_v52 = vadd.f32 %v1405_v45, %v1230_v8 }
 0x159   :  { %v1404_v41 = vsel %vm1354_vm1, %v1303_v46, %v1304_v51  ;;  %4173 = vst [vmem:[#allocation15_spill] sm:$0xff] %v3237_v52 }
 0x15a   :  { %v3235_v1 = vadd.f32 %v1404_v41, %v1231_v27  ;;  %v1085_v27 = vrot.slane %v430_v30, 7  ;;  %v1086_v41 = vrot.slane %v432_v17, 7 }
 0x15c   :  { %4172 = vst [vmem:[#allocation14_spill] sm:$0xff] %v3235_v1  ;;  %v2544_v31 = vpack.c.bf16 %v3235_v1, %v3237_v52  ;;  %v1060_v20 = vpop.f32.mrf.mxu3 }
 0x15d   :  { %v1353_v22 = vrot.slane %v1060_v20, 1  ;;  %v1186_v20 = vsel %vm1137_vm0, %v1085_v27, %v1086_v41 }
 0x15e   :  { %v940_v46 = vpop.f32.mrf.mxu2  ;;  %2680 = vst [vmem:[%s4100_s2 + $0x50] sm:$0xff] %v2544_v31   ;;  %v435_v24 = vpop.f32.mrf.mxu0  ;;  %v1187_v31 = vsel %vm1137_vm0, %v1084_v25, %v1085_v27 }
 0x15f   :  { %v1426_v45 = vsel %vm1354_vm1, %v1353_v22, %v4174_v42  ;;  %v689_v8 = vpop.f32.mrf.mxu1  ;;  %v1355_v49 = vsel %vm1354_vm1, %v4110_v63, %v1353_v22  ;;  %v1305_v23 = vrot.slane %v940_v46, 1  ;;  %v1232_v46 = vadd.f32 %v1187_v31, %v684_v13 }
 0x160   :  { %v3258_v0 = vadd.f32 %v1426_v45, %v3123_v9  ;;  %v3260_v10 = vadd.f32 %v1355_v49, %v1280_v58  ;;  %v1233_v22 = vadd.f32 %v1186_v20, %v686_v56  ;;  %v1087_v13 = vrot.slane %v435_v24, 7 }
 0x161   :  { %474 = vmatmul.bf16.gmra.mxu0 %v2451_v14  ;;  %v1403_v58 = vsel %vm1354_vm1, %v1304_v51, %v1305_v23 }
 0x162   :  { %728 = vmatmul.bf16.gmra.mxu1 %v2451_v14  ;;  %v2669_v40 = vpack.c.bf16 %v3258_v0, %v3260_v10  ;;  %v3277_v45 = vadd.f32 %v1403_v58, %v1232_v46  ;;  %v1185_v20 = vsel %vm1137_vm0, %v1086_v41, %v1087_v13 }
 0x163   :  { %982 = vmatmul.bf16.gmra.mxu2 %v2451_v14 }
 0x164   :  { %2705 = vst [vmem:[%s4100_s2 + $0x118] sm:$0xff] %v2669_v40   ;;  %v2452_v40 = vld [vmem:[%s4099_s0 + $0xa8] sm:$0xff] }
 0x165   :  { %4176 = vst [vmem:[#allocation17_spill] sm:$0xff] %v3277_v45 }
 0x166   :  { %v943_v17 = vpop.f32.mrf.mxu2  ;;  %v437_v30 = vpop.f32.mrf.mxu0 }
 0x167   :  { %v1306_v9 = vrot.slane %v943_v17, 1  ;;  %v691_v14 = vpop.f32.mrf.mxu1 }
 0x169   :  { %v1402_v42 = vsel %vm1354_vm1, %v1305_v23, %v1306_v9  ;;  %v1088_v23 = vrot.slane %v437_v30, 7 }
 0x16a   :  { %v3275_v25 = vadd.f32 %v1402_v42, %v1233_v22 }
 0x16b   :  { %v1184_v17 = vsel %vm1137_vm0, %v1087_v13, %v1088_v23 }
 0x16c   :  { %4175 = vst [vmem:[#allocation16_spill] sm:$0xff] %v3275_v25  ;;  %v2549_v49 = vpack.c.bf16 %v3275_v25, %v3277_v45  ;;  %v1235_v63 = vadd.f32 %v1184_v17, %v691_v14 }
 0x16e   :  { %v945_v27 = vpop.f32.mrf.mxu2  ;;  %2681 = vst [vmem:[%s4100_s2 + $0x58] sm:$0xff] %v2549_v49   ;;  %v440_v51 = vpop.f32.mrf.mxu0  ;;  %v1234_v49 = vadd.f32 %v1185_v20, %v689_v8 }
 0x16f   :  { %v694_v56 = vpop.f32.mrf.mxu1  ;;  %v1307_v31 = vrot.slane %v945_v27, 1  ;;  %v1089_v14 = vrot.slane %v440_v51, 7 }
 0x171   :  { %479 = vmatmul.bf16.gmra.mxu0 %v2452_v40  ;;  %v1401_v42 = vsel %vm1354_vm1, %v1306_v9, %v1307_v31  ;;  %v1183_v20 = vsel %vm1137_vm0, %v1088_v23, %v1089_v14 }
 0x172   :  { %733 = vmatmul.bf16.gmra.mxu1 %v2452_v40  ;;  %v1236_v12 = vadd.f32 %v1183_v20, %v694_v56 }
 0x173   :  { %987 = vmatmul.bf16.gmra.mxu2 %v2452_v40  ;;  %v3297_v40 = vadd.f32 %v1401_v42, %v1234_v49 }
 0x175   :  { %4178 = vst [vmem:[#allocation19_spill] sm:$0xff] %v3297_v40 }
 0x176   :  { %v948_v58 = vpop.f32.mrf.mxu2  ;;  %v442_v22 = vpop.f32.mrf.mxu0 }
 0x177   :  { %v1308_v46 = vrot.slane %v948_v58, 1  ;;  %v696_v24 = vpop.f32.mrf.mxu1  ;;  %v2453_v58 = vld [vmem:[%s4099_s0 + $0xb0] sm:$0xff] }
 0x179   :  { %v1400_v30 = vsel %vm1354_vm1, %v1307_v31, %v1308_v46  ;;  %v1090_v31 = vrot.slane %v442_v22, 7 }
 0x17a   :  { %v3295_v27 = vadd.f32 %v1400_v30, %v1235_v63 }
 0x17b   :  { %v1182_v17 = vsel %vm1137_vm0, %v1089_v14, %v1090_v31 }
 0x17c   :  { %4177 = vst [vmem:[#allocation18_spill] sm:$0xff] %v3295_v27  ;;  %v2554_v41 = vpack.c.bf16 %v3295_v27, %v3297_v40  ;;  %v1237_v11 = vadd.f32 %v1182_v17, %v696_v24 }
 0x17e   :  { %v950_v13 = vpop.f32.mrf.mxu2  ;;  %2682 = vst [vmem:[%s4100_s2 + $0x60] sm:$0xff] %v2554_v41   ;;  %v445_v8 = vpop.f32.mrf.mxu0 }
 0x17f   :  { %v699_v9 = vpop.f32.mrf.mxu1  ;;  %v1309_v63 = vrot.slane %v950_v13, 1  ;;  %v1091_v24 = vrot.slane %v445_v8, 7 }
 0x181   :  { %484 = vmatmul.bf16.gmra.mxu0 %v2453_v58  ;;  %v1399_v41 = vsel %vm1354_vm1, %v1308_v46, %v1309_v63 }
 0x182   :  { %738 = vmatmul.bf16.gmra.mxu1 %v2453_v58 }
 0x183   :  { %992 = vmatmul.bf16.gmra.mxu2 %v2453_v58  ;;  %v3317_v58 = vadd.f32 %v1399_v41, %v1236_v12  ;;  %v1181_v12 = vsel %vm1137_vm0, %v1090_v31, %v1091_v24 }
 0x184   :  { %v1238_v34 = vadd.f32 %v1181_v12, %v699_v9 }
 0x185   :  { %4180 = vst [vmem:[#allocation21_spill] sm:$0xff] %v3317_v58 }
 0x186   :  { %v953_v42 = vpop.f32.mrf.mxu2  ;;  %v447_v30 = vpop.f32.mrf.mxu0 }
 0x187   :  { %v1310_v49 = vrot.slane %v953_v42, 1  ;;  %v701_v51 = vpop.f32.mrf.mxu1  ;;  %v2454_v42 = vld [vmem:[%s4099_s0 + $0xb8] sm:$0xff] }
 0x189   :  { %v1398_v22 = vsel %vm1354_vm1, %v1309_v63, %v1310_v49  ;;  %v1092_v63 = vrot.slane %v447_v30, 7 }
 0x18a   :  { %v3315_v13 = vadd.f32 %v1398_v22, %v1237_v11 }
 0x18b   :  { %v1180_v20 = vsel %vm1137_vm0, %v1091_v24, %v1092_v63 }
 0x18c   :  { %4179 = vst [vmem:[#allocation20_spill] sm:$0xff] %v3315_v13  ;;  %v2559_v23 = vpack.c.bf16 %v3315_v13, %v3317_v58  ;;  %v1239_v33 = vadd.f32 %v1180_v20, %v701_v51 }
 0x18e   :  { %v955_v14 = vpop.f32.mrf.mxu2  ;;  %2683 = vst [vmem:[%s4100_s2 + $0x68] sm:$0xff] %v2559_v23   ;;  %v450_v56 = vpop.f32.mrf.mxu0 }
 0x18f   :  { %v704_v46 = vpop.f32.mrf.mxu1  ;;  %v1311_v11 = vrot.slane %v955_v14, 1  ;;  %v1093_v51 = vrot.slane %v450_v56, 7 }
 0x191   :  { %489 = vmatmul.bf16.gmra.mxu0 %v2454_v42  ;;  %v1397_v23 = vsel %vm1354_vm1, %v1310_v49, %v1311_v11 }
 0x192   :  { %743 = vmatmul.bf16.gmra.mxu1 %v2454_v42 }
 0x193   :  { %997 = vmatmul.bf16.gmra.mxu2 %v2454_v42  ;;  %v3337_v42 = vadd.f32 %v1397_v23, %v1238_v34  ;;  %v1179_v34 = vsel %vm1137_vm0, %v1092_v63, %v1093_v51 }
 0x194   :  { %v1240_v16 = vadd.f32 %v1179_v34, %v704_v46  ;;  %v2456_v46 = vld [vmem:[%s4099_s0 + $0xc8] sm:$0xff] }
 0x195   :  { %4182 = vst [vmem:[#allocation23_spill] sm:$0xff] %v3337_v42 }
 0x196   :  { %v958_v17 = vpop.f32.mrf.mxu2  ;;  %v452_v22 = vpop.f32.mrf.mxu0 }
 0x197   :  { %v1312_v41 = vrot.slane %v958_v17, 1  ;;  %v706_v8 = vpop.f32.mrf.mxu1  ;;  %v2455_v17 = vld [vmem:[%s4099_s0 + $0xc0] sm:$0xff] }
 0x199   :  { %v1396_v30 = vsel %vm1354_vm1, %v1311_v11, %v1312_v41  ;;  %v1094_v11 = vrot.slane %v452_v22, 7 }
 0x19a   :  { %v3335_v14 = vadd.f32 %v1396_v30, %v1239_v33 }
 0x19b   :  { %v1178_v12 = vsel %vm1137_vm0, %v1093_v51, %v1094_v11 }
 0x19c   :  { %4181 = vst [vmem:[#allocation22_spill] sm:$0xff] %v3335_v14  ;;  %v2564_v31 = vpack.c.bf16 %v3335_v14, %v3337_v42  ;;  %v1241_v15 = vadd.f32 %v1178_v12, %v706_v8 }
 0x19e   :  { %v960_v24 = vpop.f32.mrf.mxu2  ;;  %2684 = vst [vmem:[%s4100_s2 + $0x70] sm:$0xff] %v2564_v31   ;;  %v455_v9 = vpop.f32.mrf.mxu0 }
 0x19f   :  { %v709_v49 = vpop.f32.mrf.mxu1  ;;  %v1313_v33 = vrot.slane %v960_v24, 1 }
 0x1a1   :  { %494 = vmatmul.bf16.gmra.mxu0 %v2455_v17  ;;  %v1395_v31 = vsel %vm1354_vm1, %v1312_v41, %v1313_v33 }
 0x1a2   :  { %748 = vmatmul.bf16.gmra.mxu1 %v2455_v17 }
 0x1a3   :  { %1002 = vmatmul.bf16.gmra.mxu2 %v2455_v17  ;;  %v3357_v17 = vadd.f32 %v1395_v31, %v1240_v16  ;;  %v1095_v16 = vrot.slane %v455_v9, 7 }
 0x1a5   :  { %4183 = vst [vmem:[#allocation24_spill] sm:$0xff] %v3357_v17  ;;  %v1177_v34 = vsel %vm1137_vm0, %v1094_v11, %v1095_v16 }
 0x1a6   :  { %v963_v20 = vpop.f32.mrf.mxu2  ;;  %v457_v30 = vpop.f32.mrf.mxu0 }
 0x1a7   :  { %v1314_v23 = vrot.slane %v963_v20, 1  ;;  %v711_v56 = vpop.f32.mrf.mxu1  ;;  %v1096_v8 = vrot.slane %v457_v30, 7 }
 0x1a9   :  { %v1394_v22 = vsel %vm1354_vm1, %v1313_v33, %v1314_v23  ;;  %v1176_v12 = vsel %vm1137_vm0, %v1095_v16, %v1096_v8 }
 0x1aa   :  { %v3355_v24 = vadd.f32 %v1394_v22, %v1241_v15  ;;  %v1242_v22 = vadd.f32 %v1177_v34, %v709_v49  ;;  %v2457_v49 = vld [vmem:[%s4099_s0 + $0xd0] sm:$0xff] }
 0x1ac   :  { %1875 = vmatpush.msra.mxu3 %v3355_v24  ;;  %v2569_v63 = vpack.c.bf16 %v3355_v24, %v3357_v17 }
 0x1ae   :  { %v965_v51 = vpop.f32.mrf.mxu2  ;;  %2685 = vst [vmem:[%s4100_s2 + $0x78] sm:$0xff] %v2569_v63   ;;  %1876 = vmatpush.msra.mxu3 %v3357_v17  ;;  %v460_v15 = vpop.f32.mrf.mxu0  ;;  %v1243_v63 = vadd.f32 %v1176_v12, %v711_v56 }
 0x1af   :  { %v714_v41 = vpop.f32.mrf.mxu1  ;;  %v1315_v33 = vrot.slane %v965_v51, 1  ;;  %v1097_v34 = vrot.slane %v460_v15, 7 }
 0x1b0   :  { %1877 = vmatpush.msra.mxu3 %v3335_v14 }
 0x1b1   :  { %499 = vmatmul.bf16.gmra.mxu0 %v2456_v46  ;;  %v1393_v30 = vsel %vm1354_vm1, %v1314_v23, %v1315_v33 }
 0x1b2   :  { %1878 = vmatpush.msra.mxu3 %v3337_v42  ;;  %753 = vmatmul.bf16.gmra.mxu1 %v2456_v46  ;;  %v3385_v16 = vadd.f32 %v1393_v30, %v1242_v22  ;;  %v1175_v22 = vsel %vm1137_vm0, %v1096_v8, %v1097_v34 }
 0x1b3   :  { %1007 = vmatmul.bf16.gmra.mxu2 %v2456_v46 }
 0x1b4   :  { %1879 = vmatpush.msra.mxu3 %v3315_v13  ;;  %4185 = vst [vmem:[#allocation26_spill] sm:$0xff] %v3385_v16 }
 0x1b6   :  { %v968_v20 = vpop.f32.mrf.mxu2  ;;  %1880 = vmatpush.msra.mxu3 %v3317_v58  ;;  %v462_v9 = vpop.f32.mrf.mxu0 }
 0x1b7   :  { %v1316_v31 = vrot.slane %v968_v20, 1  ;;  %v716_v51 = vpop.f32.mrf.mxu1  ;;  %v1098_v12 = vrot.slane %v462_v9, 7 }
 0x1b8   :  { %1881 = vmatpush.msra.mxu3 %v3295_v27 }
 0x1b9   :  { %v1392_v46 = vsel %vm1354_vm1, %v1315_v33, %v1316_v31 }
 0x1ba   :  { %1882 = vmatpush.msra.mxu3 %v3297_v40  ;;  %v3383_v11 = vadd.f32 %v1392_v46, %v1243_v63  ;;  %v1174_v63 = vsel %vm1137_vm0, %v1097_v34, %v1098_v12 }
 0x1bc   :  { %4184 = vst [vmem:[#allocation25_spill] sm:$0xff] %v3383_v11  ;;  %1883 = vmatpush.msra.mxu3 %v3275_v25  ;;  %v2574_v20 = vpack.c.bf16 %v3383_v11, %v3385_v16 }
 0x1be   :  { %v970_v23 = vpop.f32.mrf.mxu2  ;;  %1884 = vmatpush.msra.mxu3 %v3277_v45  ;;  %2686 = vst [vmem:[%s4100_s2 + $0x80] sm:$0xff] %v2574_v20   ;;  %v465_v56 = vpop.f32.mrf.mxu0  ;;  %v1349_v45 = vrot.slane %v3180_v36, 1 }
 0x1bf   :  { %v719_v33 = vpop.f32.mrf.mxu1  ;;  %v1317_v30 = vrot.slane %v970_v23, 1  ;;  %v1245_v23 = vadd.f32 %v1174_v63, %v716_v51 }
 0x1c0   :  { %1885 = vmatpush.msra.mxu3 %v3235_v1 }
 0x1c1   :  { %504 = vmatmul.bf16.gmra.mxu0 %v2457_v49  ;;  %v1391_v9 = vsel %vm1354_vm1, %v1316_v31, %v1317_v30 }
 0x1c2   :  { %1886 = vmatpush.msra.mxu3 %v3237_v52  ;;  %758 = vmatmul.bf16.gmra.mxu1 %v2457_v49  ;;  %v1244_v52 = vadd.f32 %v1175_v22, %v714_v41  ;;  %v2458_v41 = vld [vmem:[%s4099_s0 + $0xd8] sm:$0xff] }
 0x1c3   :  { %1012 = vmatmul.bf16.gmra.mxu2 %v2457_v49 }
 0x1c4   :  { %1887 = vmatpush.msra.mxu3 %v3205_v60  ;;  %v3413_v34 = vadd.f32 %v1391_v9, %v1244_v52 }
 0x1c6   :  { %v973_v46 = vpop.f32.mrf.mxu2  ;;  %1888 = vmatpush.msra.mxu3 %v3207_v6  ;;  %v467_v15 = vpop.f32.mrf.mxu0  ;;  %4187 = vst [vmem:[#allocation28_spill] sm:$0xff] %v3413_v34 }
 0x1c7   :  { %v1318_v20 = vrot.slane %v973_v46, 1  ;;  %v721_v1 = vpop.f32.mrf.mxu1  ;;  %v1100_v22 = vrot.slane %v467_v15, 7 }
 0x1c8   :  { %1889 = vmatpush.msra.mxu3 %v3173_v54 }
 0x1c9   :  { %v1390_v49 = vsel %vm1354_vm1, %v1317_v30, %v1318_v20  ;;  %v1099_v30 = vrot.slane %v465_v56, 7 }
 0x1ca   :  { %1890 = vmatpush.msra.mxu3 %v3175_v44  ;;  %v3411_v8 = vadd.f32 %v1390_v49, %v1245_v23 }
 0x1cb   :  { %v1173_v52 = vsel %vm1137_vm0, %v1098_v12, %v1099_v30  ;;  %v1172_v9 = vsel %vm1137_vm0, %v1099_v30, %v1100_v22 }
 0x1cc   :  { %4186 = vst [vmem:[#allocation27_spill] sm:$0xff] %v3411_v8  ;;  %v2579_v46 = vpack.c.bf16 %v3411_v8, %v3413_v34  ;;  %v1246_v54 = vadd.f32 %v1173_v52, %v719_v33  ;;  %v1247_v56 = vadd.f32 %v1172_v9, %v721_v1  ;;  %v1128_v52 = vrot.slane %v2913_v43, 7 }
 0x1cd   :  { %v1129_v9 = vrot.slane %v2921_v48, 7 }
 0x1ce   :  { %v975_v6 = vpop.f32.mrf.mxu2  ;;  %2687 = vst [vmem:[%s4100_s2 + $0x88] sm:$0xff] %v2579_v46   ;;  %v470_v31 = vpop.f32.mrf.mxu0 }
 0x1cf   :  { %v724_v51 = vpop.f32.mrf.mxu1  ;;  %v1319_v63 = vrot.slane %v975_v6, 1  ;;  %v1143_v43 = vsel %vm1137_vm0, %v1128_v52, %v1129_v9 }
 0x1d0   :  { %v1276_v27 = vadd.f32 %v1143_v43, %v3048_v29  ;;  %v4192_v29 = vrot.slane %v3148_v4, 1 }
 0x1d1   :  { %509 = vmatmul.bf16.gmra.mxu0 %v2458_v41  ;;  %v1389_v46 = vsel %vm1354_vm1, %v1318_v20, %v1319_v63  ;;  %v1101_v20 = vrot.slane %v470_v31, 7 }
 0x1d2   :  { %763 = vmatmul.bf16.gmra.mxu1 %v2458_v41  ;;  %v3435_v60 = vadd.f32 %v1389_v46, %v1246_v54  ;;  %v4124_v54 = vrot.slane %v2905_v39, 7  ;;  %v1130_v46 = vrot.slane %v2925_v53, 7 }
 0x1d3   :  { %1017 = vmatmul.bf16.gmra.mxu2 %v2458_v41 }
 0x1d4   :  { %4189 = vst [vmem:[#allocation30_spill] sm:$0xff] %v3435_v60  ;;  %v1142_v48 = vsel %vm1137_vm0, %v1129_v9, %v1130_v46 }
 0x1d6   :  { %v978_v23 = vpop.f32.mrf.mxu2  ;;  %v3427_v44 = vpop.f32.mrf.mxu0 }
 0x1d7   :  { %v1320_v49 = vrot.slane %v978_v23, 1  ;;  %v726_v15 = vpop.f32.mrf.mxu1  ;;  %v2459_v23 = vld [vmem:[%s4099_s0 + $0xe0] sm:$0xff] }
 0x1d9   :  { %v1388_v6 = vsel %vm1354_vm1, %v1319_v63, %v1320_v49  ;;  %v1102_v63 = vrot.slane %v3427_v44, 7  ;;  %v1144_v44 = vsel %vm1137_vm0, %v4124_v54, %v1128_v52  ;;  %v4129_v54 = vrot.slane %v3196_v32, 1 }
 0x1da   :  { %v3433_v41 = vadd.f32 %v1388_v6, %v1247_v56  ;;  %v1171_v6 = vsel %vm1137_vm0, %v1100_v22, %v1101_v20  ;;  %v1275_v9 = vadd.f32 %v1144_v44, %v3036_v19 }
 0x1db   :  { %v1170_v31 = vsel %vm1137_vm0, %v1101_v20, %v1102_v63  ;;  %v1248_v25 = vadd.f32 %v1171_v6, %v724_v51  ;;  %v1358_v51 = vsel %vm1354_vm1, %v1349_v45, %v4129_v54  ;;  %v2460_v6 = vld [vmem:[%s4099_s0 + $0xe8] sm:$0xff] }
 0x1dc   :  { %4188 = vst [vmem:[#allocation29_spill] sm:$0xff] %v3433_v41  ;;  %v2584_v12 = vpack.c.bf16 %v3433_v41, %v3435_v60  ;;  %v1249_v52 = vadd.f32 %v1170_v31, %v726_v15  ;;  %v4193_v31 = vlaneseq }
 0x1de   :  { %v980_v30 = vpop.f32.mrf.mxu2  ;;  %2688 = vst [vmem:[%s4100_s2 + $0x90] sm:$0xff] %v2584_v12   ;;  %v475_v1 = vpop.f32.mrf.mxu0  ;;  %v1277_v12 = vadd.f32 %v1142_v48, %v3060_v55  ;;  %v3508_v44 = vand.u32 127, %v4193_v31 }
 0x1df   :  { %v3445_v33 = vpop.f32.mrf.mxu1  ;;  %v1321_v56 = vrot.slane %v980_v30, 1  ;;  %v1348_v30 = vrot.slane %v3164_v47, 1  ;;  %v1103_v43 = vrot.slane %v475_v1, 7 }
 0x1e1   :  { %514 = vmatmul.bf16.gmra.mxu0 %v2459_v23  ;;  %v1387_v20 = vsel %vm1354_vm1, %v1320_v49, %v1321_v56  ;;  %v1359_v19 = vsel %vm1354_vm1, %v1348_v30, %v1349_v45  ;;  %v1360_v55 = vsel %vm1354_vm1, %v4192_v29, %v1348_v30  ;;  %v3493_v49 = vadd.f32 %v1358_v51, %v1277_v12 }
 0x1e2   :  { %768 = vmatmul.bf16.gmra.mxu1 %v2459_v23  ;;  %v3479_v58 = vadd.f32 %v1387_v20, %v1248_v25  ;;  %v3495_v25 = vadd.f32 %v1359_v19, %v1276_v27  ;;  %v3497_v15 = vadd.f32 %v1360_v55, %v1275_v9  ;;  %v1652_v30 = vand.u32 65535, %v3508_v44 }
 0x1e3   :  { %1022 = vmatmul.bf16.gmra.mxu2 %v2459_v23  ;;  %v1169_v1 = vsel %vm1137_vm0, %v1102_v63, %v1103_v43  ;;  %v4194_v19 = vrot.slane %v2941_v2, 7  ;;  %v1351_v55 = vrot.slane %v3211_v5, 1 }
 0x1e4   :  { %4191 = vst [vmem:[#allocation32_spill] sm:$0xff] %v3479_v58  ;;  %v2659_v27 = vpack.c.bf16 %v3493_v49, %v3495_v25  ;;  %v1656_v9 = vmul.u32 58254, %v1652_v30 }
 0x1e5   :  { %v1141_v29 = vsel %vm1137_vm0, %v1130_v46, %v4194_v19  ;;  %v4135_v46 = vmov 0  }
 0x1e6   :  { %v983_v53 = vpop.f32.mrf.mxu2  ;;  %v3466_v23 = vpop.f32.mrf.mxu0  ;;  %2703 = vst [vmem:[%s4100_s2 + $0x108] sm:$0xff] %v2659_v27   ;;  %v1659_v51 = vshll.u32 %v1656_v9, 16  ;;  %v1278_v42 = vadd.f32 %v1141_v29, %v3072_v3  ;;  %v1660_v14 = vshrl.u32 %v1656_v9, 16  ;;  %v4197_v3 = vrot.slane %v3223_v59, 1 }
 0x1e7   :  { %v1322_v22 = vrot.slane %v983_v53, 1  ;;  %v731_v40 = vpop.f32.mrf.mxu1  ;;  %v1104_v12 = vrot.slane %v3466_v23, 7  ;;  %v1655_v23 = vmul.u32 14564, %v1652_v30 }
 0x1e9   :  { %v1386_v47 = vsel %vm1354_vm1, %v1321_v56, %v1322_v22  ;;  %vm1663_vm2 = vc.u32 %v1655_v23, %v1659_v51  ;;  %v1665_v2 = vadd.s32 %v1659_v51, %v1655_v23 }
 0x1ea   :  { %v3477_v53 = vadd.f32 %v1386_v47, %v1249_v52  ;;  %v1653_v52 = vshrl.u32 %v3508_v44, 16  ;;  %v1168_v47 = vsel %vm1137_vm0, %v1103_v43, %v1104_v12  ;;  %v1250_v43 = vadd.f32 %v1169_v1, %v3445_v33 }
 0x1eb   :  { %v1251_v30 = vadd.f32 %v1168_v47, %v731_v40  ;;  %v1664_v5 = vsel %vm1663_vm2, 1, %v4135_v46  ;;  %v1356_v47 = vsel %vm1354_vm1, %v1351_v55, %v4197_v3 }
 0x1ec   :  { %4190 = vst [vmem:[#allocation31_spill] sm:$0xff] %v3477_v53  ;;  %v2589_v36 = vpack.c.bf16 %v3477_v53, %v3479_v58  ;;  %v1658_v63 = vmul.u32 58254, %v1653_v52  ;;  %v3554_v51 = vadd.f32 %v1356_v47, %v3092_v26 }
 0x1ee   :  { %v985_v56 = vpop.f32.mrf.mxu2  ;;  %2689 = vst [vmem:[%s4100_s2 + $0x98] sm:$0xff] %v2589_v36   ;;  %v3505_v45 = vpop.f32.mrf.mxu0  ;;  %v1657_v36 = vmul.u32 14564, %v1653_v52 }
 0x1ef   :  { %v3512_v48 = vpop.f32.mrf.mxu1  ;;  %v1323_v20 = vrot.slane %v985_v56, 1 }
 0x1f0   :  { %v1661_v54 = vshll.u32 %v1657_v36, 16  ;;  %v1662_v23 = vshrl.u32 %v1657_v36, 16  ;;  %v1105_v36 = vrot.slane %v3505_v45, 7 }
 0x1f1   :  { %519 = vmatmul.bf16.gmra.mxu0 %v2460_v6 }
 0x1f2   :  { %773 = vmatmul.bf16.gmra.mxu1 %v2460_v6  ;;  %vm1667_vm3 = vc.u32 %v1665_v2, %v1661_v54 }
 0x1f3   :  { %1027 = vmatmul.bf16.gmra.mxu2 %v2460_v6  ;;  %v1385_v6 = vsel %vm1354_vm1, %v1322_v22, %v1323_v20  ;;  %v1666_v22 = vadd.s32 %v1664_v5, %v1658_v63  ;;  %v1668_v33 = vsel %vm1667_vm3, 1, %v4135_v46 }
 0x1f4   :  { %v3540_v52 = vadd.f32 %v1385_v6, %v1250_v43  ;;  %v2461_v6 = vld [vmem:[%s4099_s0 + $0xf0] sm:$0xff] }
 0x1f5   :  { %v1670_v40 = vadd.s32 %v1668_v33, %v1666_v22 }
 0x1f6   :  { %v988_v56 = vpop.f32.mrf.mxu2  ;;  %v3531_v27 = vpop.f32.mrf.mxu0  ;;  %4196 = vst [vmem:[#allocation34_spill] sm:$0xff] %v3540_v52 }
 0x1f7   :  { %v1324_v31 = vrot.slane %v988_v56, 1  ;;  %v736_v13 = vpop.f32.mrf.mxu1  ;;  %v1671_v59 = vadd.s32 %v1670_v40, %v1660_v14 }
 0x1f9   :  { %v1384_v19 = vsel %vm1354_vm1, %v1323_v20, %v1324_v31  ;;  %v4198_v20 = vrot.slane %v3196_v32, 1  ;;  %v1672_v63 = vadd.s32 %v1671_v59, %v1662_v23 }
 0x1fa   :  { %v3538_v56 = vadd.f32 %v1384_v19, %v1251_v30  ;;  %v1167_v30 = vsel %vm1137_vm0, %v1104_v12, %v1105_v36 }
 0x1fb   :  { %v1357_v54 = vsel %vm1354_vm1, %v4198_v20, %v1351_v55  ;;  %v1673_v14 = vshrl.u32 %v1672_v63, 4 }
 0x1fc   :  { %4195 = vst [vmem:[#allocation33_spill] sm:$0xff] %v3538_v56  ;;  %v2594_v1 = vpack.c.bf16 %v3538_v56, %v3540_v52  ;;  %v3556_v9 = vadd.f32 %v1357_v54, %v1278_v42  ;;  %v1106_v42 = vrot.slane %v3531_v27, 7  ;;  %v1252_v27 = vadd.f32 %v1167_v30, %v3512_v48 }
 0x1fd   :  { %v1674_v2 = vmul.u32 18, %v1673_v14  ;;  %v4201_v48 = vmov 0 }
 0x1fe   :  { %v990_v29 = vpop.f32.mrf.mxu2  ;;  %2690 = vst [vmem:[%s4100_s2 + $0xa0] sm:$0xff] %v2594_v1   ;;  %v485_v32 = vpop.f32.mrf.mxu0  ;;  %v2664_v55 = vpack.c.bf16 %v3554_v51, %v3556_v9  ;;  %v1166_v45 = vsel %vm1137_vm0, %v1105_v36, %v1106_v42 }
 0x1ff   :  { %v739_v26 = vpop.f32.mrf.mxu1  ;;  %v1325_v43 = vrot.slane %v990_v29, 1  ;;  %v1675_v19 = vsub.s32 %v3508_v44, %v1674_v2  ;;  %v1253_v1 = vadd.f32 %v1166_v45, %v736_v13  ;;  %v1107_v36 = vrot.slane %v485_v32, 7 }
 0x200   :  { %2704 = vst [vmem:[%s4100_s2 + $0x110] sm:$0xff] %v2664_v55  }
 0x201   :  { %524 = vmatmul.bf16.gmra.mxu0 %v2461_v6  ;;  %v1383_v40 = vsel %vm1354_vm1, %v1324_v31, %v1325_v43  ;;  %vm1794_vm4 = vcmp.ne.s32.totalorder %v1675_v19, 0  ;;  %vm1799_vm5 = vcmp.lt.s32.totalorder %v1675_v19, 0  ;;  %v1809_v47 = vadd.s32 18, %v1675_v19 }
 0x202   :  { %778 = vmatmul.bf16.gmra.mxu1 %v2461_v6  ;;  %vm1804_vm6 = vmand %vm1799_vm5, %vm1794_vm4  ;;  %v3583_v23 = vadd.f32 %v1383_v40, %v1252_v27  ;;  %v4133_v31 = vmov 1.0  }
 0x203   :  { %1032 = vmatmul.bf16.gmra.mxu2 %v2461_v6  ;;  %v1814_v20 = vsel %vm1804_vm6, %v1809_v47, %v1675_v19  ;;  %v2462_v6 = vld [vmem:[%s4099_s0 + $0xf8] sm:$0xff] }
 0x204   :  { %4200 = vst [vmem:[#allocation36_spill] sm:$0xff] %v3583_v23  ;;  %vm1819_vm7 = vcmp.ne.s32.totalorder %v1814_v20, 0  ;;  %vm1824_vm8 = vcmp.ne.s32.totalorder %v1814_v20, 17 }
 0x205   :  { %vm3585_vm9 = vmand %vm1819_vm7, %vm1824_vm8 }
 0x206   :  { %v993_v5 = vpop.f32.mrf.mxu2  ;;  %v487_v33 = vpop.f32.mrf.mxu0  ;;  %v4202_v48 = vsel %vm3585_vm9, 4294967295, %v4201_v48  ;;  %2421 = vmatmul.msk.f32.vlgmr.msrb.gmra.mxu3 %vm3585_vm9, %v4133_v31 }
 0x207   :  { %v1326_v22 = vrot.slane %v993_v5, 1  ;;  %v741_v3 = vpop.f32.mrf.mxu1  ;;  %4203 = vst [vmem:[#allocation37_spill] sm:$0xff] %v4202_v48  ;;  %v1108_v63 = vrot.slane %v487_v33, 7 }
 0x209   :  { %v1382_v12 = vsel %vm1354_vm1, %v1325_v43, %v1326_v22  ;;  %v1165_v43 = vsel %vm1137_vm0, %v1106_v42, %v1107_v36  ;;  %v1164_v30 = vsel %vm1137_vm0, %v1107_v36, %v1108_v63 }
 0x20a   :  { %v3581_v54 = vadd.f32 %v1382_v12, %v1253_v1  ;;  %v1254_v27 = vadd.f32 %v1165_v43, %v739_v26  ;;  %v1255_v40 = vadd.f32 %v1164_v30, %v741_v3 }
 0x20c   :  { %4199 = vst [vmem:[#allocation35_spill] sm:$0xff] %v3581_v54  ;;  %v2599_v13 = vpack.c.bf16 %v3581_v54, %v3583_v23 }
 0x20e   :  { %v995_v29 = vpop.f32.mrf.mxu2  ;;  %2691 = vst [vmem:[%s4100_s2 + $0xa8] sm:$0xff] %v2599_v13   ;;  %v490_v59 = vpop.f32.mrf.mxu0 }
 0x20f   :  { %v744_v55 = vpop.f32.mrf.mxu1  ;;  %v1327_v14 = vrot.slane %v995_v29, 1  ;;  %v1109_v26 = vrot.slane %v490_v59, 7 }
 0x211   :  { %529 = vmatmul.bf16.gmra.mxu0 %v2462_v6  ;;  %v1381_v19 = vsel %vm1354_vm1, %v1326_v22, %v1327_v14  ;;  %v1163_v29 = vsel %vm1137_vm0, %v1108_v63, %v1109_v26 }
 0x212   :  { %783 = vmatmul.bf16.gmra.mxu1 %v2462_v6  ;;  %v3610_v47 = vadd.f32 %v1381_v19, %v1254_v27 }
 0x213   :  { %1037 = vmatmul.bf16.gmra.mxu2 %v2462_v6 }
 0x214   :  { %4205 = vst [vmem:[#allocation39_spill] sm:$0xff] %v3610_v47 }
 0x216   :  { %v998_v2 = vpop.f32.mrf.mxu2  ;;  %v492_v5 = vpop.f32.mrf.mxu0 }
 0x217   :  { %v1328_v45 = vrot.slane %v998_v2, 1  ;;  %v746_v32 = vpop.f32.mrf.mxu1  ;;  %v1110_v3 = vrot.slane %v492_v5, 7  ;;  %v1256_v2 = vadd.f32 %v1163_v29, %v744_v55 }
 0x219   :  { %v1380_v33 = vsel %vm1354_vm1, %v1327_v14, %v1328_v45  ;;  %v1162_v6 = vsel %vm1137_vm0, %v1109_v26, %v1110_v3 }
 0x21a   :  { %v3608_v1 = vadd.f32 %v1380_v33, %v1255_v40  ;;  %v1257_v19 = vadd.f32 %v1162_v6, %v746_v32 }
 0x21c   :  { %4204 = vst [vmem:[#allocation38_spill] sm:$0xff] %v3608_v1  ;;  %v2604_v42 = vpack.c.bf16 %v3608_v1, %v3610_v47 }
 0x21e   :  { %v1000_v12 = vpop.f32.mrf.mxu2  ;;  %2692 = vst [vmem:[%s4100_s2 + $0xb0] sm:$0xff] %v2604_v42   ;;  %v495_v20 = vpop.f32.mrf.mxu0 }
 0x21f   :  { %v749_v22 = vpop.f32.mrf.mxu1  ;;  %v1329_v13 = vrot.slane %v1000_v12, 1  ;;  %v1111_v32 = vrot.slane %v495_v20, 7 }
 0x221   :  { %v1379_v30 = vsel %vm1354_vm1, %v1328_v45, %v1329_v13  ;;  %v1161_v26 = vsel %vm1137_vm0, %v1110_v3, %v1111_v32 }
 0x222   :  { %v3627_v40 = vadd.f32 %v1379_v30, %v1256_v2 }
 0x224   :  { %4207 = vst [vmem:[#allocation41_spill] sm:$0xff] %v3627_v40 }
 0x226   :  { %v1003_v36 = vpop.f32.mrf.mxu2  ;;  %v497_v43 = vpop.f32.mrf.mxu0 }
 0x227   :  { %v1330_v14 = vrot.slane %v1003_v36, 1  ;;  %v751_v27 = vpop.f32.mrf.mxu1  ;;  %v1112_v42 = vrot.slane %v497_v43, 7  ;;  %v1258_v43 = vadd.f32 %v1161_v26, %v749_v22 }
 0x229   :  { %v1378_v59 = vsel %vm1354_vm1, %v1329_v13, %v1330_v14  ;;  %v1160_v13 = vsel %vm1137_vm0, %v1111_v32, %v1112_v42  ;;  %v3670_v32 = vadd.s32 128, %v3508_v44 }
 0x22a   :  { %v3625_v5 = vadd.f32 %v1378_v59, %v1257_v19  ;;  %v1259_v30 = vadd.f32 %v1160_v13, %v751_v27 }
 0x22b   :  { %v1681_v26 = vand.u32 65535, %v3670_v32 }
 0x22c   :  { %4206 = vst [vmem:[#allocation40_spill] sm:$0xff] %v3625_v5  ;;  %1895 = vmatpush.msrb.mxu3 %v3625_v5  ;;  %v2609_v63 = vpack.c.bf16 %v3625_v5, %v3627_v40 }
 0x22e   :  { %v1005_v33 = vpop.f32.mrf.mxu2  ;;  %2693 = vst [vmem:[%s4100_s2 + $0xb8] sm:$0xff] %v2609_v63   ;;  %1896 = vmatpush.msrb.mxu3 %v3627_v40  ;;  %v500_v55 = vpop.f32.mrf.mxu0 }
 0x22f   :  { %v754_v45 = vpop.f32.mrf.mxu1  ;;  %v1331_v12 = vrot.slane %v1005_v33, 1  ;;  %v1113_v33 = vrot.slane %v500_v55, 7  ;;  %v1682_v55 = vshrl.u32 %v3670_v32, 16 }
 0x230   :  { %1897 = vmatpush.msrb.mxu3 %v3608_v1 }
 0x231   :  { %v1377_v20 = vsel %vm1354_vm1, %v1330_v14, %v1331_v12  ;;  %v1686_v31 = vmul.u32 14564, %v1682_v55 }
 0x232   :  { %1898 = vmatpush.msrb.mxu3 %v3610_v47  ;;  %v3654_v59 = vadd.f32 %v1377_v20, %v1258_v43  ;;  %v1685_v43 = vmul.u32 58254, %v1681_v26 }
 0x234   :  { %1899 = vmatpush.msrb.mxu3 %v3581_v54 }
 0x236   :  { %v1008_v29 = vpop.f32.mrf.mxu2  ;;  %1900 = vmatpush.msrb.mxu3 %v3583_v23  ;;  %v3644_v36 = vpop.f32.mrf.mxu0 }
 0x237   :  { %v1332_v6 = vrot.slane %v1008_v29, 1  ;;  %v756_v2 = vpop.f32.mrf.mxu1  ;;  %v1159_v29 = vsel %vm1137_vm0, %v1112_v42, %v1113_v33  ;;  %v1688_v42 = vshll.u32 %v1685_v43, 16 }
 0x238   :  { %1901 = vmatpush.msrb.mxu3 %v3538_v56  ;;  %v1260_v46 = vadd.f32 %v1159_v29, %v754_v45 }
 0x239   :  { %v1376_v3 = vsel %vm1354_vm1, %v1331_v12, %v1332_v6  ;;  %v1114_v12 = vrot.slane %v3644_v36, 7 }
 0x23a   :  { %1902 = vmatpush.msrb.mxu3 %v3540_v52  ;;  %v3652_v19 = vadd.f32 %v1376_v3, %v1259_v30 }
 0x23b   :  { %v1158_v30 = vsel %vm1137_vm0, %v1113_v33, %v1114_v12  ;;  %v1687_v33 = vmul.u32 58254, %v1682_v55 }
 0x23c   :  { %1903 = vmatpush.msrb.mxu3 %v3477_v53  ;;  %v2614_v63 = vpack.c.bf16 %v3652_v19, %v3654_v59 }
 0x23e   :  { %v1010_v14 = vpop.f32.mrf.mxu2  ;;  %1904 = vmatpush.msrb.mxu3 %v3479_v58  ;;  %2694 = vst [vmem:[%s4100_s2 + $0xc0] sm:$0xff] %v2614_v63   ;;  %v3663_v22 = vpop.f32.mrf.mxu0 }
 0x23f   :  { %v3665_v27 = vpop.f32.mrf.mxu1  ;;  %v1333_v13 = vrot.slane %v1010_v14, 1  ;;  %v1684_v14 = vmul.u32 14564, %v1681_v26  ;;  %v3694_v26 = vadd.s32 256, %v3508_v44 }
 0x240   :  { %1905 = vmatpush.msrb.mxu3 %v3433_v41  ;;  %v4208_v41 = vmov 0  }
 0x241   :  { %vm1692_vm10 = vc.u32 %v1684_v14, %v1688_v42  ;;  %v1694_v53 = vadd.s32 %v1688_v42, %v1684_v14 }
 0x242   :  { %1906 = vmatpush.msrb.mxu3 %v3435_v60  ;;  %v1261_v60 = vadd.f32 %v1158_v30, %v756_v2  ;;  %v1693_v58 = vsel %vm1692_vm10, 1, %v4208_v41  ;;  %v1711_v30 = vshrl.u32 %v3694_v26, 16 }
 0x244   :  { %1907 = vmatpush.msrb.mxu3 %v3411_v8  ;;  %v1375_v8 = vsel %vm1354_vm1, %v1332_v6, %v1333_v13  ;;  %v1710_v6 = vand.u32 65535, %v3694_v26  ;;  %v1716_v52 = vmul.u32 58254, %v1711_v30 }
 0x245   :  { %v3698_v29 = vadd.f32 %v1375_v8, %v1260_v46  ;;  %v1715_v46 = vmul.u32 14564, %v1711_v30 }
 0x246   :  { %v3677_v20 = vpop.f32.mrf.mxu2  ;;  %1908 = vmatpush.msrb.mxu3 %v3413_v34  ;;  %v3684_v3 = vpop.f32.mrf.mxu0 }
 0x247   :  { %v1334_v36 = vrot.slane %v3677_v20, 1  ;;  %v761_v63 = vpop.f32.mrf.mxu1  ;;  %v1690_v20 = vshll.u32 %v1686_v31, 16  ;;  %v1719_v56 = vshll.u32 %v1715_v46, 16 }
 0x248   :  { %1909 = vmatpush.msrb.mxu3 %v3383_v11  ;;  %v1695_v11 = vadd.s32 %v1693_v58, %v1687_v33  ;;  %v1714_v58 = vmul.u32 58254, %v1710_v6 }
 0x249   :  { %v1374_v34 = vsel %vm1354_vm1, %v1333_v13, %v1334_v36  ;;  %vm1696_vm11 = vc.u32 %v1694_v53, %v1690_v20  ;;  %v1689_v13 = vshrl.u32 %v1685_v43, 16  ;;  %v1713_v53 = vmul.u32 14564, %v1710_v6 }
 0x24a   :  { %1910 = vmatpush.msrb.mxu3 %v3385_v16  ;;  %v3696_v45 = vadd.f32 %v1374_v34, %v1261_v60  ;;  %v1697_v55 = vsel %vm1696_vm11, 1, %v4208_v41  ;;  %v1115_v60 = vrot.slane %v3663_v22, 7  ;;  %v1691_v34 = vshrl.u32 %v1686_v31, 16 }
 0x24b   :  { %v1699_v16 = vadd.s32 %v1697_v55, %v1695_v11  ;;  %v1116_v43 = vrot.slane %v3684_v3, 7  ;;  %v1717_v20 = vshll.u32 %v1714_v58, 16 }
 0x24c   :  { %v2619_v14 = vpack.c.bf16 %v3696_v45, %v3698_v29  ;;  %v1157_v22 = vsel %vm1137_vm0, %v1114_v12, %v1115_v60 }
 0x24d   :  { %v1700_v33 = vadd.s32 %v1699_v16, %v1689_v13  ;;  %vm1721_vm12 = vc.u32 %v1713_v53, %v1717_v20  ;;  %v1723_v55 = vadd.s32 %v1717_v20, %v1713_v53  ;;  %v1156_v6 = vsel %vm1137_vm0, %v1115_v60, %v1116_v43 }
 0x24e   :  { %v1015_v2 = vpop.f32.mrf.mxu2  ;;  %v3705_v42 = vpop.f32.mrf.mxu0  ;;  %2695 = vst [vmem:[%s4100_s2 + $0xc8] sm:$0xff] %v2619_v14   ;;  %v1722_v31 = vsel %vm1721_vm12, 1, %v4208_v41  ;;  %v1718_v16 = vshrl.u32 %v1714_v58, 16  ;;  %v1263_v20 = vadd.f32 %v1156_v6, %v761_v63  ;;  %v1720_v60 = vshrl.u32 %v1715_v46, 16 }
 0x24f   :  { %v3708_v8 = vpop.f32.mrf.mxu1  ;;  %v1335_v23 = vrot.slane %v1015_v2, 1  ;;  %v1701_v11 = vadd.s32 %v1700_v33, %v1691_v34  ;;  %v1724_v14 = vadd.s32 %v1722_v31, %v1716_v52  ;;  %vm1725_vm13 = vc.u32 %v1723_v55, %v1719_v56 }
 0x250   :  { %v1726_v13 = vsel %vm1725_vm13, 1, %v4208_v41  ;;  %v1262_v33 = vadd.f32 %v1157_v22, %v3665_v27  ;;  %v4209_v22 = vmov 0  ;;  %v4212_v6 = vmov 1.0  }
 0x251   :  { %v1702_v54 = vshrl.u32 %v1701_v11, 4  ;;  %v1728_v53 = vadd.s32 %v1726_v13, %v1724_v14  ;;  %v1373_v12 = vsel %vm1354_vm1, %v1334_v36, %v1335_v23 }
 0x252   :  { %v3730_v55 = vadd.f32 %v1373_v12, %v1262_v33 }
 0x253   :  { %v1703_v34 = vmul.u32 18, %v1702_v54  ;;  %v1729_v56 = vadd.s32 %v1728_v53, %v1718_v16 }
 0x255   :  { %v1704_v52 = vsub.s32 %v3670_v32, %v1703_v34  ;;  %v1730_v36 = vadd.s32 %v1729_v56, %v1720_v60 }
 0x256   :  { %v1018_v3 = vpop.f32.mrf.mxu2  ;;  %v3720_v2 = vpop.f32.mrf.mxu0 }
 0x257   :  { %v1336_v30 = vrot.slane %v1018_v3, 1  ;;  %v766_v47 = vpop.f32.mrf.mxu1  ;;  %vm1795_vm14 = vcmp.ne.s32.totalorder %v1704_v52, 0  ;;  %vm1800_vm15 = vcmp.lt.s32.totalorder %v1704_v52, 0  ;;  %v1810_v54 = vadd.s32 18, %v1704_v52 }
 0x258   :  { %vm1805_vm2 = vmand %vm1800_vm15, %vm1795_vm14  ;;  %v1731_v32 = vshrl.u32 %v1730_v36, 4  ;;  %v1117_v3 = vrot.slane %v3705_v42, 7  ;;  %v1118_v16 = vrot.slane %v3720_v2, 7 }
 0x259   :  { %v1372_v58 = vsel %vm1354_vm1, %v1335_v23, %v1336_v30  ;;  %v1815_v63 = vsel %vm1805_vm2, %v1810_v54, %v1704_v52 }
 0x25a   :  { %v3728_v11 = vadd.f32 %v1372_v58, %v1263_v20  ;;  %vm1820_vm3 = vcmp.ne.s32.totalorder %v1815_v63, 0  ;;  %vm1825_vm4 = vcmp.ne.s32.totalorder %v1815_v63, 17  ;;  %v1732_v14 = vmul.u32 18, %v1731_v32 }
 0x25b   :  { %vm3737_vm5 = vmand %vm1820_vm3, %vm1825_vm4  ;;  %v1155_v12 = vsel %vm1137_vm0, %v1116_v43, %v1117_v3  ;;  %v1154_v33 = vsel %vm1137_vm0, %v1117_v3, %v1118_v16  ;;  %v4150_v20 = vrot.slane %v3135_v28, 1  ;;  %v4213_v43 = vmov 0 }
 0x25c   :  { %v2624_v27 = vpack.c.bf16 %v3728_v11, %v3730_v55  ;;  %v4210_v22 = vsel %vm3737_vm5, 4294967295, %v4209_v22  ;;  %2422 = vmatmul.msk.f32.vlgmr.msra.gmra.mxu3 %vm3737_vm5, %v4212_v6  ;;  %v1733_v13 = vsub.s32 %v3694_v26, %v1732_v14  ;;  %v1264_v2 = vadd.f32 %v1155_v12, %v3708_v8 }
 0x25d   :  { %4211 = vst [vmem:[#allocation42_spill] sm:$0xff] %v4210_v22  ;;  %v1265_v58 = vadd.f32 %v1154_v33, %v766_v47 }
 0x25e   :  { %v1020_v46 = vpop.f32.mrf.mxu2  ;;  %2696 = vst [vmem:[%s4100_s2 + $0xd0] sm:$0xff] %v2624_v27   ;;  %v515_v23 = vpop.f32.mrf.mxu0  ;;  %vm1796_vm6 = vcmp.ne.s32.totalorder %v1733_v13, 0  ;;  %vm1801_vm7 = vcmp.lt.s32.totalorder %v1733_v13, 0  ;;  %v1811_v53 = vadd.s32 18, %v1733_v13 }
 0x25f   :  { %v769_v31 = vpop.f32.mrf.mxu1  ;;  %v1337_v34 = vrot.slane %v1020_v46, 1  ;;  %vm1806_vm8 = vmand %vm1801_vm7, %vm1796_vm6  ;;  %v1119_v3 = vrot.slane %v515_v23, 7 }
 0x260   :  { %v1816_v52 = vsel %vm1806_vm8, %v1811_v53, %v1733_v13 }
 0x261   :  { %vm1821_vm10 = vcmp.ne.s32.totalorder %v1816_v52, 0  ;;  %vm1826_vm11 = vcmp.ne.s32.totalorder %v1816_v52, 17  ;;  %v1371_v26 = vsel %vm1354_vm1, %v1336_v30, %v1337_v34  ;;  %v4216_v30 = vrot.slane %v3148_v4, 1 }
 0x262   :  { %vm3755_vm12 = vmand %vm1821_vm10, %vm1826_vm11  ;;  %v3766_v63 = vadd.f32 %v1371_v26, %v1264_v2  ;;  %v1153_v4 = vsel %vm1137_vm0, %v1118_v16, %v1119_v3 }
 0x263   :  { %v4214_v43 = vsel %vm3755_vm12, 4294967295, %v4213_v43  ;;  %v3774_v47 = vsel %vm1354_vm1, %v4150_v20, %v4216_v30  ;;  %v1266_v26 = vadd.f32 %v1153_v4, %v769_v31 }
 0x264   :  { %4215 = vst [vmem:[#allocation43_spill] sm:$0xff] %v4214_v43  ;;  %2423 = vmatmul.msk.f32.vlgmr.msrb.gmra.mxu3 %vm3755_vm12, %v4212_v6 }
 0x266   :  { %v1023_v60 = vpop.f32.mrf.mxu2  ;;  %v517_v56 = vpop.f32.mrf.mxu0 }
 0x267   :  { %v1338_v42 = vrot.slane %v1023_v60, 1  ;;  %v771_v54 = vpop.f32.mrf.mxu1  ;;  %v1120_v13 = vrot.slane %v517_v56, 7 }
 0x269   :  { %v1370_v36 = vsel %vm1354_vm1, %v1337_v34, %v1338_v42  ;;  %v1152_v53 = vsel %vm1137_vm0, %v1119_v3, %v1120_v13 }
 0x26a   :  { %v3764_v27 = vadd.f32 %v1370_v36, %v1265_v58  ;;  %v1267_v2 = vadd.f32 %v1152_v53, %v771_v54 }
 0x26c   :  { %v2629_v8 = vpack.c.bf16 %v3764_v27, %v3766_v63 }
 0x26e   :  { %v1025_v46 = vpop.f32.mrf.mxu2  ;;  %2697 = vst [vmem:[%s4100_s2 + $0xd8] sm:$0xff] %v2629_v8   ;;  %v520_v32 = vpop.f32.mrf.mxu0 }
 0x26f   :  { %v774_v14 = vpop.f32.mrf.mxu1  ;;  %v1339_v34 = vrot.slane %v1025_v46, 1 }
 0x271   :  { %v1369_v52 = vsel %vm1354_vm1, %v1338_v42, %v1339_v34  ;;  %v1121_v42 = vrot.slane %v520_v32, 7 }
 0x272   :  { %v3791_v36 = vadd.f32 %v1369_v52, %v1266_v26 }
 0x273   :  { %v1151_v3 = vsel %vm1137_vm0, %v1120_v13, %v1121_v42 }
 0x274   :  { %v1268_v26 = vadd.f32 %v1151_v3, %v774_v14 }
 0x276   :  { %v1028_v12 = vpop.f32.mrf.mxu2  ;;  %v522_v60 = vpop.f32.mrf.mxu0 }
 0x277   :  { %v1340_v33 = vrot.slane %v1028_v12, 1  ;;  %v776_v58 = vpop.f32.mrf.mxu1  ;;  %v1122_v31 = vrot.slane %v522_v60, 7 }
 0x279   :  { %v1368_v23 = vsel %vm1354_vm1, %v1339_v34, %v1340_v33  ;;  %v1150_v34 = vsel %vm1137_vm0, %v1121_v42, %v1122_v31 }
 0x27a   :  { %v3789_v56 = vadd.f32 %v1368_v23, %v1267_v2  ;;  %v1269_v2 = vadd.f32 %v1150_v34, %v776_v58  ;;  %v3805_v23 = vadd.s32 384, %v3508_v44 }
 0x27c   :  { %v2634_v16 = vpack.c.bf16 %v3789_v56, %v3791_v36 }
 0x27e   :  { %v1030_v30 = vpop.f32.mrf.mxu2  ;;  %2698 = vst [vmem:[%s4100_s2 + $0xe0] sm:$0xff] %v2634_v16   ;;  %v525_v8 = vpop.f32.mrf.mxu0  ;;  %v1739_v16 = vand.u32 65535, %v3805_v23 }
 0x27f   :  { %v779_v54 = vpop.f32.mrf.mxu1  ;;  %v1341_v46 = vrot.slane %v1030_v30, 1 }
 0x280   :  { %v1743_v14 = vmul.u32 58254, %v1739_v16  ;;  %v1742_v3 = vmul.u32 14564, %v1739_v16 }
 0x281   :  { %v1367_v52 = vsel %vm1354_vm1, %v1340_v33, %v1341_v46  ;;  %v1740_v33 = vshrl.u32 %v3805_v23, 16 }
 0x282   :  { %v3811_v13 = vadd.f32 %v1367_v52, %v1268_v26  ;;  %v1746_v34 = vshll.u32 %v1743_v14, 16  ;;  %v1123_v52 = vrot.slane %v525_v8, 7  ;;  %v3829_v8 = vadd.s32 512, %v3508_v44 }
 0x283   :  { %v1745_v1 = vmul.u32 58254, %v1740_v33  ;;  %v4217_v44 = vrot.slane %v2905_v39, 7 }
 0x284   :  { %vm1750_vm13 = vc.u32 %v1742_v3, %v1746_v34  ;;  %v1149_v43 = vsel %vm1137_vm0, %v1122_v31, %v1123_v52 }
 0x285   :  { %v1751_v16 = vsel %vm1750_vm13, 1, %v4208_v41 }
 0x286   :  { %v1033_v4 = vpop.f32.mrf.mxu2  ;;  %v527_v12 = vpop.f32.mrf.mxu0 }
 0x287   :  { %v1342_v53 = vrot.slane %v1033_v4, 1  ;;  %v781_v30 = vpop.f32.mrf.mxu1  ;;  %v1124_v26 = vrot.slane %v527_v12, 7  ;;  %v1270_v12 = vadd.f32 %v1149_v43, %v779_v54 }
 0x289   :  { %v1366_v32 = vsel %vm1354_vm1, %v1341_v46, %v1342_v53  ;;  %v3820_v46 = vmul.u32 14564, %v1740_v33  ;;  %v1148_v40 = vsel %vm1137_vm0, %v1123_v52, %v1124_v26  ;;  %v1768_v52 = vand.u32 65535, %v3829_v8 }
 0x28a   :  { %v3809_v60 = vadd.f32 %v1366_v32, %v1269_v2  ;;  %v1752_v32 = vadd.s32 %v1746_v34, %v1742_v3  ;;  %v1271_v31 = vadd.f32 %v1148_v40, %v781_v30  ;;  %v1753_v34 = vadd.s32 %v1751_v16, %v1745_v1 }
 0x28b   :  { %v1748_v2 = vshll.u32 %v3820_v46, 16  ;;  %v1769_v40 = vshrl.u32 %v3829_v8, 16  ;;  %v1747_v30 = vshrl.u32 %v1743_v14, 16 }
 0x28c   :  { %v2639_v42 = vpack.c.bf16 %v3809_v60, %v3811_v13 }
 0x28d   :  { %vm1754_vm14 = vc.u32 %v1752_v32, %v1748_v2  ;;  %v1771_v32 = vmul.u32 14564, %v1768_v52  ;;  %v1773_v16 = vmul.u32 14564, %v1769_v40 }
 0x28e   :  { %v1035_v58 = vpop.f32.mrf.mxu2  ;;  %2699 = vst [vmem:[%s4100_s2 + $0xe8] sm:$0xff] %v2639_v42   ;;  %v530_v4 = vpop.f32.mrf.mxu0  ;;  %v1755_v2 = vsel %vm1754_vm14, 1, %v4208_v41 }
 0x28f   :  { %v1343_v20 = vrot.slane %v1035_v58, 1  ;;  %v784_v42 = vpop.f32.mrf.mxu1  ;;  %v1125_v5 = vrot.slane %v530_v4, 7  ;;  %v1757_v39 = vadd.s32 %v1755_v2, %v1753_v34  ;;  %v1777_v34 = vshll.u32 %v1773_v16, 16 }
 0x290   :  { %v4218_v2 = vrot.slane %v3135_v28, 1 }
 0x291   :  { %v1365_v58 = vsel %vm1354_vm1, %v1342_v53, %v1343_v20  ;;  %v1147_v1 = vsel %vm1137_vm0, %v1124_v26, %v1125_v5 }
 0x292   :  { %v3843_v54 = vadd.f32 %v1365_v58, %v1270_v12  ;;  %v1272_v58 = vadd.f32 %v1147_v1, %v784_v42 }
 0x296   :  { %v1038_v22 = vpop.f32.mrf.mxu2  ;;  %v532_v3 = vpop.f32.mrf.mxu0 }
 0x297   :  { %v1344_v48 = vrot.slane %v1038_v22, 1  ;;  %v1126_v33 = vrot.slane %v532_v3, 7 }
 0x299   :  { %v1364_v17 = vsel %vm1354_vm1, %v1343_v20, %v1344_v48  ;;  %v1145_v43 = vsel %vm1137_vm0, %v1126_v33, %v4217_v44  ;;  %v1772_v20 = vmul.u32 58254, %v1768_v52 }
 0x29a   :  { %v3841_v22 = vadd.f32 %v1364_v17, %v1271_v31  ;;  %v1274_v53 = vadd.f32 %v1145_v43, %v3019_v38  ;;  %v1146_v17 = vsel %vm1137_vm0, %v1125_v5, %v1126_v33  ;;  %v786_v38 = vpop.f32.mrf.mxu1  ;;  %v1749_v5 = vshrl.u32 %v3820_v46, 16 }
 0x29b   :  { %v1775_v3 = vshll.u32 %v1772_v20, 16  ;;  %v1273_v52 = vadd.f32 %v1146_v17, %v786_v38  ;;  %v1758_v33 = vadd.s32 %v1757_v39, %v1747_v30  ;;  %v1774_v43 = vmul.u32 58254, %v1769_v40 }
 0x29c   :  { %v2644_v4 = vpack.c.bf16 %v3841_v22, %v3843_v54  ;;  %v3854_v12 = vadd.f32 %v3774_v47, %v1274_v53  ;;  %v1778_v17 = vshrl.u32 %v1773_v16, 16 }
 0x29d   :  { %vm1779_vm15 = vc.u32 %v1771_v32, %v1775_v3  ;;  %v1781_v47 = vadd.s32 %v1775_v3, %v1771_v32  ;;  %v1759_v30 = vadd.s32 %v1758_v33, %v1749_v5  ;;  %v1973_v5 = vmul.f32 %v3141_v62, %v3141_v62 }
 0x29e   :  { %v1040_v31 = vpop.f32.mrf.mxu2  ;;  %2700 = vst [vmem:[%s4100_s2 + $0xf0] sm:$0xff] %v2644_v4   ;;  %v2654_v26 = vpack.c.bf16 %v3497_v15, %v3854_v12  ;;  %v1780_v46 = vsel %vm1779_vm15, 1, %v4208_v41  ;;  %v1776_v4 = vshrl.u32 %v1772_v20, 16  ;;  %v1972_v33 = vmul.f32 %v3143_v35, %v3143_v35 }
 0x29f   :  { %v1345_v14 = vrot.slane %v1040_v31, 1  ;;  %vm1783_vm0 = vc.u32 %v1781_v47, %v1777_v34  ;;  %v1782_v57 = vadd.s32 %v1780_v46, %v1774_v43  ;;  %v1760_v40 = vshrl.u32 %v1759_v30, 4  ;;  %v4222_v43 = vld [vmem:[#allocation9_spill] sm:$0xff]  ;;  %v4223_v46 = vld [vmem:[#allocation4_spill] sm:$0xff]  ;;  %v4225_v30 = vld [vmem:[#allocation2_spill] sm:$0xff] }
 0x2a0   :  { %2702 = vst [vmem:[%s4100_s2 + $0x100] sm:$0xff] %v2654_v26   ;;  %v2735_v34 = vmov 0.0   ;;  %v1971_v47 = vmul.f32 %v3111_v61, %v3111_v61  ;;  %v1970_v62 = vmul.f32 %v3113_v7, %v3113_v7  ;;  %v1968_v35 = vmul.f32 %v3082_v18, %v3082_v18 }
 0x2a1   :  { %v1362_v42 = vsel %vm1354_vm1, %v1345_v14, %v4218_v2  ;;  %v1363_v44 = vsel %vm1354_vm1, %v1344_v48, %v1345_v14  ;;  %v1784_v48 = vsel %vm1783_vm0, 1, %v4208_v41  ;;  %v1761_v32 = vmul.u32 18, %v1760_v40  ;;  %1848 = vst [vmem:[%s4101_s3] sm:$0x1] %v2735_v34  ;;  %v4227_v40 = vld [vmem:[#allocation6_spill] sm:$0xff] }
 0x2a2   :  { %v3871_v1 = vadd.f32 %v1362_v42, %v1273_v52  ;;  %v3873_v53 = vadd.f32 %v1363_v44, %v1272_v58  ;;  %v1786_v39 = vadd.s32 %v1784_v48, %v1782_v57  ;;  %vm1851_vm0 = vcmask 523264   ;;  %v4221_v44 = vld [vmem:[#allocation8_spill] sm:$0xff]  ;;  %v4226_v57 = vld [vmem:[#allocation3_spill] sm:$0xff]  ;;  %1849 = vst [vmem:[%s4102_s4] sm:$0x1] %v2735_v34 }
 0x2a3   :  { %v1762_v58 = vsub.s32 %v3805_v23, %v1761_v32  ;;  %v1969_v2 = vmul.f32 %v3080_v21, %v3080_v21  ;;  %v1967_v42 = vmul.f32 %v3054_v50, %v3054_v50  ;;  %v1966_v61 = vmul.f32 %v3056_v37, %v3056_v37 }
 0x2a4   :  { %1915 = vmatpush.msra.mxu3 %v3871_v1  ;;  %v2649_v28 = vpack.c.bf16 %v3871_v1, %v3873_v53  ;;  %v1787_v3 = vadd.s32 %v1786_v39, %v1776_v4  ;;  %v1965_v7 = vmul.f32 %v4221_v44, %v4221_v44  ;;  %v1964_v21 = vmul.f32 %v4222_v43, %v4222_v43  ;;  %v4228_v39 = vld [vmem:[#allocation7_spill] sm:$0xff]  ;;  %v4239_v44 = vld [vmem:[#allocation14_spill] sm:$0xff] }
 0x2a5   :  { %vm1797_vm1 = vcmp.ne.s32.totalorder %v1762_v58, 0  ;;  %vm1802_vm2 = vcmp.lt.s32.totalorder %v1762_v58, 0  ;;  %v1812_v20 = vadd.s32 18, %v1762_v58  ;;  %v1963_v18 = vmul.f32 %v4223_v46, %v4223_v46  ;;  %v4240_v43 = vld [vmem:[#allocation15_spill] sm:$0xff]  ;;  %v4241_v46 = vld [vmem:[#allocation12_spill] sm:$0xff] }
 0x2a6   :  { %2701 = vst [vmem:[%s4100_s2 + $0xf8] sm:$0xff] %v2649_v28   ;;  %1916 = vmatpush.msra.mxu3 %v3873_v53  ;;  %v1788_v31 = vadd.s32 %v1787_v3, %v1778_v17  ;;  %vm1807_vm3 = vmand %vm1802_vm2, %vm1797_vm1  ;;  %v4224_v28 = vld [vmem:[#allocation5_spill] sm:$0xff]  ;;  %v1961_v37 = vmul.f32 %v4225_v30, %v4225_v30  ;;  %v1960_v48 = vmul.f32 %v4226_v57, %v4226_v57  ;;  %v4229_v3 = vld [vmem:[#allocation24_spill] sm:$0xff] }
 0x2a7   :  { %v1817_v38 = vsel %vm1807_vm3, %v1812_v20, %v1762_v58  ;;  %v1962_v50 = vmul.f32 %v4224_v28, %v4224_v28  ;;  %v1959_v4 = vmul.f32 %v4227_v40, %v4227_v40  ;;  %v1958_v32 = vmul.f32 %v4228_v39, %v4228_v39  ;;  %v4242_v28 = vld [vmem:[#allocation13_spill] sm:$0xff]  ;;  %v4243_v30 = vld [vmem:[#allocation10_spill] sm:$0xff]  ;;  %v4244_v57 = vld [vmem:[#allocation11_spill] sm:$0xff] }
 0x2a8   :  { %1917 = vmatpush.msra.mxu3 %v3841_v22  ;;  %v1789_v41 = vshrl.u32 %v1788_v31, 4  ;;  %vm1822_vm4 = vcmp.ne.s32.totalorder %v1817_v38, 0  ;;  %vm1827_vm6 = vcmp.ne.s32.totalorder %v1817_v38, 17  ;;  %v1989_v17 = vmul.f32 %v3355_v24, %v3355_v24  ;;  %v4245_v40 = vld [vmem:[#allocation40_spill] sm:$0xff]  ;;  %v4249_v31 = vld [vmem:[#allocation39_spill] sm:$0xff] }
 0x2a9   :  { %vm3899_vm7 = vmand %vm1822_vm4, %vm1827_vm6  ;;  %v1988_v58 = vmul.f32 %v4229_v3, %v4229_v3  ;;  %v4248_v3 = vld [vmem:[#allocation38_spill] sm:$0xff]  ;;  %v2018_v39 = vmul.f32 %v3843_v54, %v3843_v54  ;;  %v2024_v14 = vmul.f32 %v3495_v25, %v3495_v25 }
 0x2aa   :  { %1918 = vmatpush.msra.mxu3 %v3843_v54  ;;  %v1790_v16 = vmul.u32 18, %v1789_v41  ;;  %v4231_v41 = vld [vmem:[#allocation22_spill] sm:$0xff]  ;;  %v2013_v54 = vmul.f32 %v3764_v27, %v3764_v27 }
 0x2ab   :  { %v1987_v20 = vmul.f32 %v4231_v41, %v4231_v41  ;;  %v2002_v41 = vmul.f32 %v4249_v31, %v4249_v31 }
 0x2ac   :  { %1919 = vmatpush.msra.mxu3 %v3809_v60  ;;  %v1791_v23 = vsub.s32 %v3829_v8, %v1790_v16  ;;  %v4232_v16 = vld [vmem:[#allocation23_spill] sm:$0xff] }
 0x2ad   :  { %v1986_v38 = vmul.f32 %v4232_v16, %v4232_v16 }
 0x2ae   :  { %1920 = vmatpush.msra.mxu3 %v3811_v13  ;;  %vm1798_vm8 = vcmp.ne.s32.totalorder %v1791_v23, 0  ;;  %vm1803_vm10 = vcmp.lt.s32.totalorder %v1791_v23, 0  ;;  %v1813_v26 = vadd.s32 18, %v1791_v23 }
 0x2af   :  { %vm1808_vm11 = vmand %vm1803_vm10, %vm1798_vm8 }
 0x2b0   :  { %1921 = vmatpush.msra.mxu3 %v3789_v56  ;;  %v1818_v8 = vsel %vm1808_vm11, %v1813_v26, %v1791_v23  ;;  %v4233_v23 = vld [vmem:[#allocation20_spill] sm:$0xff]  ;;  %v4234_v26 = vld [vmem:[#allocation21_spill] sm:$0xff] }
 0x2b1   :  { %vm1823_vm13 = vcmp.ne.s32.totalorder %v1818_v8, 0  ;;  %vm1828_vm14 = vcmp.ne.s32.totalorder %v1818_v8, 17  ;;  %v1985_v24 = vmul.f32 %v4233_v23, %v4233_v23  ;;  %v1984_v8 = vmul.f32 %v4234_v26, %v4234_v26 }
 0x2b2   :  { %1922 = vmatpush.msra.mxu3 %v3791_v36  ;;  %vm1833_vm15 = vmand %vm1823_vm13, %vm1828_vm14 }
 0x2b3   :  { %v3915_v52 = vsel %vm1833_vm15, 1.0, %v2735_v34  ;;  %v2022_v34 = vmul.f32 %v3854_v12, %v3854_v12 }
 0x2b4   :  { %1923 = vmatpush.msra.mxu3 %v3764_v27  ;;  %v2008_v27 = vmul.f32 %v3698_v29, %v3698_v29 }
 0x2b6   :  { %1924 = vmatpush.msra.mxu3 %v3766_v63 }
 0x2b8   :  { %1925 = vmatpush.msra.mxu3 %v3728_v11 }
 0x2ba   :  { %1926 = vmatpush.msra.mxu3 %v3730_v55 }
 0x2bc   :  { %1927 = vmatpush.msra.mxu3 %v3696_v45 }
 0x2be   :  { %1928 = vmatpush.msra.mxu3 %v3698_v29  ;;  %v2028_v29 = vmul.f32 %v3260_v10, %v3260_v10 }
 0x2c0   :  { %1929 = vmatpush.msra.mxu3 %v3652_v19 }
 0x2c2   :  { %1930 = vmatpush.msra.mxu3 %v3654_v59 }
 0x2c3   :  { %2424 = vmatmul.msk.f32.vlgmr.msra.gmra.mxu3 %vm3899_vm7, %v4212_v6 }
 0x2c4   :  { %1943 = vmatpush.msrb.mxu3 %v3258_v0 }
 0x2c6   :  { %1944 = vmatpush.msrb.mxu3 %v3260_v10 }
 0x2c8   :  { %1945 = vmatpush.msrb.mxu3 %v3554_v51 }
 0x2ca   :  { %1946 = vmatpush.msrb.mxu3 %v3556_v9 }
 0x2cc   :  { %1947 = vmatpush.msrb.mxu3 %v3493_v49 }
 0x2ce   :  { %1948 = vmatpush.msrb.mxu3 %v3495_v25  ;;  %v1957_v25 = vld [vmem:[%s4102_s4] sm:$0x1] }
 0x2d0   :  { %1949 = vmatpush.msrb.mxu3 %v3497_v15 }
 0x2d2   :  { %1950 = vmatpush.msrb.mxu3 %v3854_v12 }
 0x2d3   :  { %2425 = vmatmul.msk.f32.vlgmr.msrb.gmra.mxu3 %vm1851_vm0, %v3915_v52 }
 0x2d4   :  { %2030 = vmatpush.msra.mxu3 %v1973_v5  ;;  %v4235_v5 = vld [vmem:[#allocation18_spill] sm:$0xff] }
 0x2d6   :  { %2031 = vmatpush.msra.mxu3 %v1972_v33  ;;  %v1983_v33 = vmul.f32 %v4235_v5, %v4235_v5 }
 0x2d8   :  { %2032 = vmatpush.msra.mxu3 %v1971_v47  ;;  %v4236_v47 = vld [vmem:[#allocation19_spill] sm:$0xff] }
 0x2da   :  { %2033 = vmatpush.msra.mxu3 %v1970_v62  ;;  %v1982_v62 = vmul.f32 %v4236_v47, %v4236_v47 }
 0x2dc   :  { %2034 = vmatpush.msra.mxu3 %v1969_v2  ;;  %v4237_v2 = vld [vmem:[#allocation16_spill] sm:$0xff] }
 0x2de   :  { %2035 = vmatpush.msra.mxu3 %v1968_v35  ;;  %v1981_v35 = vmul.f32 %v4237_v2, %v4237_v2 }
 0x2e0   :  { %2036 = vmatpush.msra.mxu3 %v1967_v42  ;;  %v4238_v42 = vld [vmem:[#allocation17_spill] sm:$0xff] }
 0x2e2   :  { %2037 = vmatpush.msra.mxu3 %v1966_v61  ;;  %v1980_v61 = vmul.f32 %v4238_v42, %v4238_v42 }
 0x2e4   :  { %2038 = vmatpush.msra.mxu3 %v1965_v7  ;;  %v1979_v7 = vmul.f32 %v4239_v44, %v4239_v44 }
 0x2e6   :  { %2039 = vmatpush.msra.mxu3 %v1964_v21  ;;  %v1978_v21 = vmul.f32 %v4240_v43, %v4240_v43 }
 0x2e8   :  { %2040 = vmatpush.msra.mxu3 %v1963_v18  ;;  %v1977_v18 = vmul.f32 %v4241_v46, %v4241_v46 }
 0x2ea   :  { %2041 = vmatpush.msra.mxu3 %v1962_v50  ;;  %v1976_v50 = vmul.f32 %v4242_v28, %v4242_v28 }
 0x2ec   :  { %2042 = vmatpush.msra.mxu3 %v1961_v37  ;;  %v1975_v37 = vmul.f32 %v4243_v30, %v4243_v30 }
 0x2ee   :  { %2043 = vmatpush.msra.mxu3 %v1960_v48  ;;  %v1974_v48 = vmul.f32 %v4244_v57, %v4244_v57  ;;  %v1872_v57 = vpop.f32.mrf.mxu3 }
 0x2f0   :  { %2044 = vmatpush.msra.mxu3 %v1959_v4  ;;  %v2005_v4 = vmul.f32 %v4245_v40, %v4245_v40  ;;  %v2020_v40 = vmul.f32 %v3873_v53, %v3873_v53  ;;  %v2015_v53 = vmul.f32 %v3789_v56, %v3789_v56  ;;  %v2010_v56 = vmul.f32 %v3730_v55, %v3730_v55 }
 0x2f1   :  { %v2029_v55 = vmul.f32 %v3258_v0, %v3258_v0  ;;  %v2026_v0 = vmul.f32 %v3556_v9, %v3556_v9  ;;  %v2023_v9 = vmul.f32 %v3497_v15, %v3497_v15 }
 0x2f2   :  { %2045 = vmatpush.msra.mxu3 %v1958_v32  ;;  %v4247_v32 = vld [vmem:[#allocation41_spill] sm:$0xff] }
 0x2f3   :  { %2426 = vmatmul.msk.f32.vlgmr.msra.gmra.mxu3 %vm3585_vm9, %v4212_v6 }
 0x2f4   :  { %2050 = vmatpush.msrb.mxu3 %v1989_v17  ;;  %v2004_v17 = vmul.f32 %v4247_v32, %v4247_v32  ;;  %v2016_v32 = vmul.f32 %v3811_v13, %v3811_v13  ;;  %v2011_v13 = vmul.f32 %v3728_v11, %v3728_v11  ;;  %v2006_v11 = vmul.f32 %v3654_v59, %v3654_v59  ;;  %v1850_v59 = vld [vmem:[%s4101_s3] sm:$0x1] }
 0x2f6   :  { %2051 = vmatpush.msrb.mxu3 %v1988_v58  ;;  %v2003_v58 = vmul.f32 %v4248_v3, %v4248_v3 }
 0x2f8   :  { %2052 = vmatpush.msrb.mxu3 %v1987_v20  ;;  %v4250_v20 = vld [vmem:[#allocation35_spill] sm:$0xff] }
 0x2f9   :  { %v2001_v16 = vmul.f32 %v4250_v20, %v4250_v20 }
 0x2fa   :  { %2053 = vmatpush.msrb.mxu3 %v1986_v38  ;;  %v4251_v38 = vld [vmem:[#allocation36_spill] sm:$0xff] }
 0x2fb   :  { %v2000_v23 = vmul.f32 %v4251_v38, %v4251_v38 }
 0x2fc   :  { %2054 = vmatpush.msrb.mxu3 %v1985_v24  ;;  %v4252_v24 = vld [vmem:[#allocation33_spill] sm:$0xff] }
 0x2fd   :  { %v1999_v26 = vmul.f32 %v4252_v24, %v4252_v24 }
 0x2fe   :  { %2055 = vmatpush.msrb.mxu3 %v1984_v8  ;;  %v4253_v8 = vld [vmem:[#allocation34_spill] sm:$0xff] }
 0x2ff   :  { %v1998_v5 = vmul.f32 %v4253_v8, %v4253_v8 }
 0x300   :  { %2056 = vmatpush.msrb.mxu3 %v1983_v33  ;;  %v4254_v33 = vld [vmem:[#allocation31_spill] sm:$0xff] }
 0x301   :  { %v1997_v47 = vmul.f32 %v4254_v33, %v4254_v33 }
 0x302   :  { %2057 = vmatpush.msrb.mxu3 %v1982_v62  ;;  %v4255_v62 = vld [vmem:[#allocation32_spill] sm:$0xff] }
 0x303   :  { %v1996_v2 = vmul.f32 %v4255_v62, %v4255_v62 }
 0x304   :  { %2058 = vmatpush.msrb.mxu3 %v1981_v35  ;;  %v4256_v35 = vld [vmem:[#allocation29_spill] sm:$0xff] }
 0x305   :  { %v1995_v42 = vmul.f32 %v4256_v35, %v4256_v35 }
 0x306   :  { %2059 = vmatpush.msrb.mxu3 %v1980_v61  ;;  %v4257_v61 = vld [vmem:[#allocation30_spill] sm:$0xff] }
 0x307   :  { %v1994_v44 = vmul.f32 %v4257_v61, %v4257_v61 }
 0x308   :  { %2060 = vmatpush.msrb.mxu3 %v1979_v7  ;;  %v4258_v7 = vld [vmem:[#allocation27_spill] sm:$0xff] }
 0x309   :  { %v1993_v43 = vmul.f32 %v4258_v7, %v4258_v7 }
 0x30a   :  { %2061 = vmatpush.msrb.mxu3 %v1978_v21  ;;  %v4259_v21 = vld [vmem:[#allocation28_spill] sm:$0xff] }
 0x30b   :  { %v1992_v46 = vmul.f32 %v4259_v21, %v4259_v21 }
 0x30c   :  { %2062 = vmatpush.msrb.mxu3 %v1977_v18  ;;  %v4260_v18 = vld [vmem:[#allocation25_spill] sm:$0xff] }
 0x30d   :  { %v1991_v28 = vmul.f32 %v4260_v18, %v4260_v18 }
 0x30e   :  { %2063 = vmatpush.msrb.mxu3 %v1976_v50  ;;  %v4261_v50 = vld [vmem:[#allocation26_spill] sm:$0xff] }
 0x30f   :  { %v1990_v30 = vmul.f32 %v4261_v50, %v4261_v50 }
 0x310   :  { %2064 = vmatpush.msrb.mxu3 %v1975_v37  ;;  %v2021_v37 = vmul.f32 %v3871_v1, %v3871_v1  ;;  %v2017_v1 = vmul.f32 %v3809_v60, %v3809_v60  ;;  %v2012_v60 = vmul.f32 %v3766_v63, %v3766_v63  ;;  %v2007_v63 = vmul.f32 %v3652_v19, %v3652_v19 }
 0x312   :  { %2065 = vmatpush.msrb.mxu3 %v1974_v48 }
 0x313   :  { %2427 = vmatmul.msk.f32.vlgmr.msrb.gmra.mxu3 %vm3737_vm5, %v4212_v6 }
 0x314   :  { %2070 = vmatpush.msra.mxu3 %v2005_v4  ;;  %v2019_v4 = vmul.f32 %v3841_v22, %v3841_v22  ;;  %v2014_v22 = vmul.f32 %v3791_v36, %v3791_v36  ;;  %v2009_v36 = vmul.f32 %v3696_v45, %v3696_v45 }
 0x316   :  { %2071 = vmatpush.msra.mxu3 %v2004_v17  ;;  %v1892_v17 = vpop.f32.mrf.mxu3 }
 0x317   :  { %v1893_v31 = vadd.f32 %v1892_v17, %v1872_v57 }
 0x318   :  { %2072 = vmatpush.msra.mxu3 %v2003_v58 }
 0x31a   :  { %2073 = vmatpush.msra.mxu3 %v2002_v41  ;;  %v2027_v41 = vmul.f32 %v3554_v51, %v3554_v51  ;;  %v2025_v51 = vmul.f32 %v3493_v49, %v3493_v49 }
 0x31c   :  { %2074 = vmatpush.msra.mxu3 %v2001_v16 }
 0x31e   :  { %2075 = vmatpush.msra.mxu3 %v2000_v23  ;;  %v1912_v3 = vpop.f32.mrf.mxu3 }
 0x31f   :  { %v1913_v45 = vadd.f32 %v1912_v3, %v1893_v31 }
 0x320   :  { %2076 = vmatpush.msra.mxu3 %v1999_v26 }
 0x322   :  { %2077 = vmatpush.msra.mxu3 %v1998_v5 }
 0x324   :  { %2078 = vmatpush.msra.mxu3 %v1997_v47 }
 0x326   :  { %2079 = vmatpush.msra.mxu3 %v1996_v2 }
 0x328   :  { %2080 = vmatpush.msra.mxu3 %v1995_v42 }
 0x32a   :  { %2081 = vmatpush.msra.mxu3 %v1994_v44 }
 0x32c   :  { %2082 = vmatpush.msra.mxu3 %v1993_v43 }
 0x32e   :  { %2083 = vmatpush.msra.mxu3 %v1992_v46 }
 0x330   :  { %2084 = vmatpush.msra.mxu3 %v1991_v28 }
 0x332   :  { %2085 = vmatpush.msra.mxu3 %v1990_v30 }
 0x333   :  { %2428 = vmatmul.msk.f32.vlgmr.msra.gmra.mxu3 %vm3755_vm12, %v4212_v6 }
 0x334   :  { %2090 = vmatpush.msrb.mxu3 %v2021_v37 }
 0x336   :  { %2091 = vmatpush.msrb.mxu3 %v2020_v40 }
 0x338   :  { %2092 = vmatpush.msrb.mxu3 %v2019_v4 }
 0x33a   :  { %2093 = vmatpush.msrb.mxu3 %v2018_v39 }
 0x33c   :  { %2094 = vmatpush.msrb.mxu3 %v2017_v1 }
 0x33e   :  { %2095 = vmatpush.msrb.mxu3 %v2016_v32 }
 0x340   :  { %2096 = vmatpush.msrb.mxu3 %v2015_v53 }
 0x342   :  { %2097 = vmatpush.msrb.mxu3 %v2014_v22 }
 0x344   :  { %2098 = vmatpush.msrb.mxu3 %v2013_v54 }
 0x346   :  { %2099 = vmatpush.msrb.mxu3 %v2012_v60  ;;  %v1932_v58 = vpop.f32.mrf.mxu3 }
 0x347   :  { %v1933_v19 = vadd.f32 %v1932_v58, %v1913_v45 }
 0x348   :  { %2100 = vmatpush.msrb.mxu3 %v2011_v13 }
 0x34a   :  { %2101 = vmatpush.msrb.mxu3 %v2010_v56 }
 0x34c   :  { %2102 = vmatpush.msrb.mxu3 %v2009_v36 }
 0x34e   :  { %2103 = vmatpush.msrb.mxu3 %v2008_v27 }
 0x350   :  { %2104 = vmatpush.msrb.mxu3 %v2007_v63 }
 0x352   :  { %2105 = vmatpush.msrb.mxu3 %v2006_v11 }
 0x353   :  { %2429 = vmatmul.msk.f32.vlgmr.msrb.gmra.mxu3 %vm3899_vm7, %v4212_v6 }
 0x354   :  { %2118 = vmatpush.msra.mxu3 %v2029_v55 }
 0x356   :  { %2119 = vmatpush.msra.mxu3 %v2028_v29  ;;  %v1952_v20 = vpop.f32.mrf.mxu3 }
 0x357   :  { %v1953_v6 = vadd.f32 %v1952_v20, %v1933_v19 }
 0x358   :  { %2120 = vmatpush.msra.mxu3 %v2027_v41 }
 0x359   :  { %v1955_v10 = vadd.f32 %v1953_v6, %v1850_v59 }
 0x35a   :  { %2121 = vmatpush.msra.mxu3 %v2026_v0 }
 0x35b   :  { %1956 = vst [vmem:[%s4101_s3] sm:$0x1] %v1955_v10 }
 0x35c   :  { %2122 = vmatpush.msra.mxu3 %v2025_v51 }
 0x35e   :  { %2123 = vmatpush.msra.mxu3 %v2024_v14 }
 0x360   :  { %2124 = vmatpush.msra.mxu3 %v2023_v9 }
 0x362   :  { %2125 = vmatpush.msra.mxu3 %v2022_v34 }
 0x363   :  { %2430 = vmatmul.msk.f32.vlgmr.msra.gmra.mxu3 %vm1851_vm0, %v3915_v52 }
 0x376   :  { %v2047_v49 = vpop.f32.mrf.mxu3 }
 0x396   :  { %v2067_v16 = vpop.f32.mrf.mxu3 }
 0x397   :  { %v2068_v24 = vadd.f32 %v2067_v16, %v2047_v49 }
 0x3b6   :  { %v2087_v38 = vpop.f32.mrf.mxu3 }
 0x3b7   :  { %v2088_v26 = vadd.f32 %v2087_v38, %v2068_v24 }
 0x3d6   :  { %v2107_v23 = vpop.f32.mrf.mxu3 }
 0x3d7   :  { %v2108_v8 = vadd.f32 %v2107_v23, %v2088_v26 }
 0x3e6   :  { %v2127_v15 = vpop.f32.mrf.mxu3 }
 0x3e7   :  { %v2128_v5 = vadd.f32 %v2127_v15, %v2108_v8 }
 0x3e9   :  { %v2130_v33 = vadd.f32 %v2128_v5, %v1957_v25 }
 0x3eb   :  { %2131 = vst [vmem:[%s4102_s4] sm:$0x1] %v2130_v33 }

</bundles_post_ra>
